<compile_context>
chip_gen: v5e
topology: v5e:2x2
jax: 0.10.0
libtpu: 0.0.40
codegen_flags: <defaults>
</compile_context>

<pallas_src>
import functools
import math

import jax
import jax.numpy as jnp
from jax.experimental import pallas as pl
from jax.experimental.pallas import tpu as pltpu

# ----------------------------- config ---------------------------------------
VOCAB = 128
HIDDEN = 128
NUM_LAYERS = 2
NUM_HEADS = 4
HEAD_DIM = HIDDEN // NUM_HEADS
FFN_DIM = 256
MAX_POS = 16
NUM_LABELS = 4
CLS_PAD = 128          # lane-dense padded classifier width
LN_EPS = 1e-12


# --------------------------- in-kernel helpers -------------------------------
def _ln(x, g, b, eps):
    """LayerNorm along last axis; g/b are (1, H) lane-major rows."""
    mean = jnp.mean(x, axis=-1, keepdims=True)
    xc = x - mean
    var = jnp.mean(xc * xc, axis=-1, keepdims=True)
    return xc * jax.lax.rsqrt(var + eps) * g + b


def _gelu(y):
    # TODO(synk): HF BERT uses exact erf-GELU; tanh approximation used here.
    c = math.sqrt(2.0 / math.pi)
    return 0.5 * y * (1.0 + jnp.tanh(c * (y + 0.044715 * y * y * y)))


# --------------------------- fused whole-model kernel ------------------------
def _bert_fused_kernel(
    emb_ref, mask_ref, emb_ln_g_ref, emb_ln_b_ref,
    wqkv_ref, bqkv_ref, wo_ref, bo_ref, ln1_g_ref, ln1_b_ref,
    w1_ref, b1_ref, w2_ref, b2_ref, ln2_g_ref, ln2_b_ref,
    pool_w_ref, pool_b_ref, cls_w_ref, cls_b_ref,
    out_ref,
    x_scr,
    *, batch, seq, num_heads, head_dim, eps,
):
    """One grid step == one encoder layer. Activation resident in VMEM scratch."""
    layer = pl.program_id(0)
    H = num_heads * head_dim
    scale = 1.0 / math.sqrt(head_dim)

    # --- layer 0 prologue: embedding LayerNorm -------------------------------
    @pl.when(layer == 0)
    def _():
        x_scr[...] = _ln(emb_ref[...], emb_ln_g_ref[...], emb_ln_b_ref[...], eps)

    x = x_scr[...]                               # (B*S, H) f32
    x_b16 = x.astype(jnp.bfloat16)

    # --- fused QKV projection on the full (B*S, H) slab: one MXU pass --------
    qkv = (jnp.dot(x_b16, wqkv_ref[...], preferred_element_type=jnp.float32)
           + bqkv_ref[...])                      # (B*S, 3H) f32
    qkv_b16 = qkv.astype(jnp.bfloat16)           # hoisted cast, sliced per head

    # --- per-batch / per-head attention; ctx gathered lane-dense -------------
    ctx_rows = []
    for b in range(batch):
        r0 = b * seq
        bias = mask_ref[b:b + 1, :]              # (1, S) additive mask bias
        head_ctx = []
        for h in range(num_heads):
            c0 = h * head_dim
            qh = qkv_b16[r0:r0 + seq, c0:c0 + head_dim]                # (S, dh)
            kh = qkv_b16[r0:r0 + seq, H + c0:H + c0 + head_dim]        # (S, dh)
            vh = qkv_b16[r0:r0 + seq, 2 * H + c0:2 * H + c0 + head_dim]

            # TODO(synk): transposed-RHS dot_general implies an XLU transpose of
            # the K tile per head; negligible at S=8, revisit for real seq lens.
            scores = jax.lax.dot_general(
                qh, kh, (((1,), (1,)), ((), ())),
                preferred_element_type=jnp.float32) * scale + bias     # (S, S)

            m = jnp.max(scores, axis=-1, keepdims=True)
            p = jnp.exp(scores - m)
            probs = p / jnp.sum(p, axis=-1, keepdims=True)             # exact divide

            head_ctx.append(jnp.dot(probs.astype(jnp.bfloat16), vh,
                                    preferred_element_type=jnp.float32))
        ctx_rows.append(jnp.concatenate(head_ctx, axis=-1))            # (S, H)
    ctx = jnp.concatenate(ctx_rows, axis=0)                            # (B*S, H)

    # --- single full-depth (K=H) output projection + residual + LN1 ----------
    attn = (jnp.dot(ctx.astype(jnp.bfloat16), wo_ref[...],
                    preferred_element_type=jnp.float32) + bo_ref[...])
    x1 = _ln(attn + x, ln1_g_ref[...], ln1_b_ref[...], eps)

    # --- FFN (GELU) -----------------------------------------------------------
    h1 = (jnp.dot(x1.astype(jnp.bfloat16), w1_ref[...],
                  preferred_element_type=jnp.float32) + b1_ref[...])
    h1 = _gelu(h1)
    h2 = (jnp.dot(h1.astype(jnp.bfloat16), w2_ref[...],
                  preferred_element_type=jnp.float32) + b2_ref[...])

    # --- residual + LayerNorm 2; write activation back for the next layer ----
    x_new = _ln(h2 + x1, ln2_g_ref[...], ln2_b_ref[...], eps)
    x_scr[...] = x_new

    # --- last layer epilogue: pooler + classifier -----------------------------
    @pl.when(layer == pl.num_programs(0) - 1)
    def _():
        cls_tok = jnp.concatenate(
            [x_new[b * seq:b * seq + 1, :] for b in range(batch)], axis=0)  # (B, H)
        pooled = jnp.tanh(
            jnp.dot(cls_tok.astype(jnp.bfloat16), pool_w_ref[...],
                    preferred_element_type=jnp.float32) + pool_b_ref[...])
        out_ref[...] = (jnp.dot(pooled.astype(jnp.bfloat16), cls_w_ref[...],
                                preferred_element_type=jnp.float32)
                        + cls_b_ref[...])


# ------------------------------ wrapper --------------------------------------
def bert_finetune_forward(params, input_ids, attention_mask):
    B, S = input_ids.shape
    H, F, L = HIDDEN, FFN_DIM, NUM_LAYERS

    # embeddings: plain-JAX gather + adds (XLA fuses these fine)
    # TODO(synk): token_type ids hard-coded to 0 (single segment); positions assume S <= MAX_POS.
    emb = (jnp.take(params["word_emb"], input_ids, axis=0)
           + params["pos_emb"][None, :S, :]
           + params["type_emb"][0][None, None, :]).reshape(B * S, H)

    # HF-style additive mask bias, one row per batch element: (B, S)
    mask_bias = (1.0 - attention_mask.astype(jnp.float32)) * (-1e9)

    kernel = functools.partial(_bert_fused_kernel, batch=B, seq=S,
                               num_heads=NUM_HEADS, head_dim=HEAD_DIM, eps=LN_EPS)

    def const2(shape):
        return pl.BlockSpec(shape, lambda l: (0, 0))

    def per_layer(shape2d):
        return pl.BlockSpec((None,) + shape2d, lambda l: (l, 0, 0))

    in_specs = (
        [const2((B * S, H)),              # emb
         const2((B, S)),                  # mask bias
         const2((1, H)),                  # emb ln gamma
         const2((1, H))]                  # emb ln beta
        + [per_layer((H, 3 * H)),         # wqkv
           per_layer((1, 3 * H)),         # bqkv
           per_layer((H, H)),             # wo
           per_layer((1, H)),             # bo
           per_layer((1, H)),             # ln1_g
           per_layer((1, H)),             # ln1_b
           per_layer((H, F)),             # w1
           per_layer((1, F)),             # b1
           per_layer((F, H)),             # w2
           per_layer((1, H)),             # b2
           per_layer((1, H)),             # ln2_g
           per_layer((1, H))]             # ln2_b
        + [const2((H, H)),                # pool_w
           const2((1, H)),                # pool_b
           const2((H, CLS_PAD)),          # cls_w_pad
           const2((1, CLS_PAD))]          # cls_b_pad
    )

    logits_pad = pl.pallas_call(
        kernel,
        out_shape=jax.ShapeDtypeStruct((B, CLS_PAD), jnp.float32),
        grid_spec=pltpu.PrefetchScalarGridSpec(
            num_scalar_prefetch=0,
            grid=(L,),
            in_specs=in_specs,
            out_specs=pl.BlockSpec((B, CLS_PAD), lambda l: (0, 0)),
            scratch_shapes=[pltpu.VMEM((B * S, H), jnp.float32)],
        ),
        compiler_params=pltpu.CompilerParams(
            dimension_semantics=("arbitrary",)),   # layer axis carries state
    )(emb, mask_bias, params["emb_ln_g"], params["emb_ln_b"],
      params["wqkv"], params["bqkv"], params["wo"], params["bo"],
      params["ln1_g"], params["ln1_b"], params["w1"], params["b1"],
      params["w2"], params["b2"], params["ln2_g"], params["ln2_b"],
      params["pool_w"], params["pool_b"], params["cls_w_pad"], params["cls_b_pad"])

    return logits_pad[:, :NUM_LABELS]               # (B, NUM_LABELS)


# ----------------------------- parameters -----------------------------------
def init_params(key):
    def nxt():
        nonlocal key
        key, sub = jax.random.split(key)
        return sub

    def w(shape, dtype=jnp.bfloat16):
        return (0.02 * jax.random.normal(nxt(), shape, jnp.float32)).astype(dtype)

    L, H, F = NUM_LAYERS, HIDDEN, FFN_DIM
    cls_w = 0.02 * jax.random.normal(nxt(), (H, NUM_LABELS), jnp.float32)

    params = {
        "word_emb": w((VOCAB, H), jnp.float32),
        "pos_emb": w((MAX_POS, H), jnp.float32),
        "type_emb": w((2, H), jnp.float32),
        "emb_ln_g": jnp.ones((1, H), jnp.float32),
        "emb_ln_b": jnp.zeros((1, H), jnp.float32),
        # stacked per-layer encoder weights (leading layer axis) -> auto-prefetched
        "wqkv": w((L, H, 3 * H)),                         # fused Q|K|V, bf16
        "bqkv": jnp.zeros((L, 1, 3 * H), jnp.float32),
        "wo": w((L, H, H)),
        "bo": jnp.zeros((L, 1, H), jnp.float32),
        "ln1_g": jnp.ones((L, 1, H), jnp.float32),
        "ln1_b": jnp.zeros((L, 1, H), jnp.float32),
        "w1": w((L, H, F)),
        "b1": jnp.zeros((L, 1, F), jnp.float32),
        "w2": w((L, F, H)),
        "b2": jnp.zeros((L, 1, H), jnp.float32),
        "ln2_g": jnp.ones((L, 1, H), jnp.float32),
        "ln2_b": jnp.zeros((L, 1, H), jnp.float32),
        # pooler + classifier (classifier padded lane-dense to 128 columns)
        "pool_w": w((H, H)),
        "pool_b": jnp.zeros((1, H), jnp.float32),
        "cls_w_pad": jnp.zeros((H, CLS_PAD), jnp.float32)
                        .at[:, :NUM_LABELS].set(cls_w).astype(jnp.bfloat16),
        "cls_b_pad": jnp.zeros((1, CLS_PAD), jnp.float32),
    }
    return params


# ------------------------------- main ---------------------------------------
if __name__ == "__main__":
    B, S = 2, 8
    key = jax.random.PRNGKey(0)
    k_ids, k_params = jax.random.split(key)

    input_ids = jax.random.randint(k_ids, (B, S), 0, VOCAB, dtype=jnp.int32)
    attention_mask = jnp.ones((B, S), dtype=jnp.int32).at[1, 6:].set(0)

    params = init_params(k_params)

    forward = jax.jit(bert_finetune_forward)
    logits = forward(params, input_ids, attention_mask)
    jax.block_until_ready(logits)

    assert logits.shape == (B, NUM_LABELS)
    assert bool(jnp.all(jnp.isfinite(logits)))
    print("KERNEL_OK")
</pallas_src>

<mosaic_0001>
module attributes {stable_mosaic.version = 11 : i64} {
  func.func @_bert_fused_kernel(%arg0: i32, %arg1: memref<16x128xf32, #tpu.memory_space<vmem>>, %arg2: memref<2x8xf32, #tpu.memory_space<vmem>>, %arg3: memref<1x128xf32, #tpu.memory_space<vmem>>, %arg4: memref<1x128xf32, #tpu.memory_space<vmem>>, %arg5: memref<1x128x384xbf16, #tpu.memory_space<vmem>>, %arg6: memref<1x1x384xf32, #tpu.memory_space<vmem>>, %arg7: memref<1x128x128xbf16, #tpu.memory_space<vmem>>, %arg8: memref<1x1x128xf32, #tpu.memory_space<vmem>>, %arg9: memref<1x1x128xf32, #tpu.memory_space<vmem>>, %arg10: memref<1x1x128xf32, #tpu.memory_space<vmem>>, %arg11: memref<1x128x256xbf16, #tpu.memory_space<vmem>>, %arg12: memref<1x1x256xf32, #tpu.memory_space<vmem>>, %arg13: memref<1x256x128xbf16, #tpu.memory_space<vmem>>, %arg14: memref<1x1x128xf32, #tpu.memory_space<vmem>>, %arg15: memref<1x1x128xf32, #tpu.memory_space<vmem>>, %arg16: memref<1x1x128xf32, #tpu.memory_space<vmem>>, %arg17: memref<128x128xbf16, #tpu.memory_space<vmem>>, %arg18: memref<1x128xf32, #tpu.memory_space<vmem>>, %arg19: memref<128x128xbf16, #tpu.memory_space<vmem>>, %arg20: memref<1x128xf32, #tpu.memory_space<vmem>>, %arg21: memref<2x128xf32, #tpu.memory_space<vmem>>, %arg22: memref<16x128xf32, #tpu.memory_space<vmem>>) attributes {dimension_semantics = [#tpu.dimension_semantics<arbitrary>], iteration_bounds = array<i64: 2>, scalar_prefetch = 0 : i64, scratch_operands = 1 : i64, tpu.core_type = #tpu.core_type<tc>, window_params = [{pipeline_mode = #tpu.pipeline_mode<synchronous>, transform_indices = @transform_0, window_bounds = array<i64: 16, 128>}, {pipeline_mode = #tpu.pipeline_mode<synchronous>, transform_indices = @transform_1, window_bounds = array<i64: 2, 8>}, {pipeline_mode = #tpu.pipeline_mode<synchronous>, transform_indices = @transform_2, window_bounds = array<i64: 1, 128>}, {pipeline_mode = #tpu.pipeline_mode<synchronous>, transform_indices = @transform_3, window_bounds = array<i64: 1, 128>}, {transform_indices = @transform_4, window_bounds = array<i64: 1, 128, 384>}, {transform_indices = @transform_5, window_bounds = array<i64: 1, 1, 384>}, {transform_indices = @transform_6, window_bounds = array<i64: 1, 128, 128>}, {transform_indices = @transform_7, window_bounds = array<i64: 1, 1, 128>}, {transform_indices = @transform_8, window_bounds = array<i64: 1, 1, 128>}, {transform_indices = @transform_9, window_bounds = array<i64: 1, 1, 128>}, {transform_indices = @transform_10, window_bounds = array<i64: 1, 128, 256>}, {transform_indices = @transform_11, window_bounds = array<i64: 1, 1, 256>}, {transform_indices = @transform_12, window_bounds = array<i64: 1, 256, 128>}, {transform_indices = @transform_13, window_bounds = array<i64: 1, 1, 128>}, {transform_indices = @transform_14, window_bounds = array<i64: 1, 1, 128>}, {transform_indices = @transform_15, window_bounds = array<i64: 1, 1, 128>}, {pipeline_mode = #tpu.pipeline_mode<synchronous>, transform_indices = @transform_16, window_bounds = array<i64: 128, 128>}, {pipeline_mode = #tpu.pipeline_mode<synchronous>, transform_indices = @transform_17, window_bounds = array<i64: 1, 128>}, {pipeline_mode = #tpu.pipeline_mode<synchronous>, transform_indices = @transform_18, window_bounds = array<i64: 128, 128>}, {pipeline_mode = #tpu.pipeline_mode<synchronous>, transform_indices = @transform_19, window_bounds = array<i64: 1, 128>}, {pipeline_mode = #tpu.pipeline_mode<synchronous>, transform_indices = @transform_20, window_bounds = array<i64: 2, 128>}]} {
    %c0_i32 = arith.constant 0 : i32
    %0 = arith.cmpi eq, %arg0, %c0_i32 : i32
    %1 = arith.extui %0 : i1 to i32
    %c0_i32_0 = arith.constant 0 : i32
    %2 = arith.cmpi ne, %1, %c0_i32_0 : i32
    scf.if %2 {
      %c0_101 = arith.constant 0 : index
      %c0_102 = arith.constant 0 : index
      %261 = vector.load %arg1[%c0_101, %c0_102] : memref<16x128xf32, #tpu.memory_space<vmem>>, vector<16x128xf32>
      %c0_103 = arith.constant 0 : index
      %c0_104 = arith.constant 0 : index
      %262 = vector.load %arg3[%c0_103, %c0_104] : memref<1x128xf32, #tpu.memory_space<vmem>>, vector<1x128xf32>
      %c0_105 = arith.constant 0 : index
      %c0_106 = arith.constant 0 : index
      %263 = vector.load %arg4[%c0_105, %c0_106] : memref<1x128xf32, #tpu.memory_space<vmem>>, vector<1x128xf32>
      %cst_107 = arith.constant dense<0.000000e+00> : vector<16xf32>
      %264 = vector.multi_reduction <add>, %261, %cst_107 [1] : vector<16x128xf32> to vector<16xf32>
      %265 = vector.shape_cast %264 : vector<16xf32> to vector<16x1xf32>
      %cst_108 = arith.constant 1.280000e+02 : f32
      %266 = vector.broadcast %cst_108 : f32 to vector<16x1xf32>
      %267 = arith.divf %265, %266 : vector<16x1xf32>
      %268 = vector.broadcast %267 : vector<16x1xf32> to vector<16x128xf32>
      %269 = arith.subf %261, %268 : vector<16x128xf32>
      %270 = arith.mulf %269, %269 : vector<16x128xf32>
      %cst_109 = arith.constant dense<0.000000e+00> : vector<16xf32>
      %271 = vector.multi_reduction <add>, %270, %cst_109 [1] : vector<16x128xf32> to vector<16xf32>
      %272 = vector.shape_cast %271 : vector<16xf32> to vector<16x1xf32>
      %cst_110 = arith.constant 1.280000e+02 : f32
      %273 = vector.broadcast %cst_110 : f32 to vector<16x1xf32>
      %274 = arith.divf %272, %273 : vector<16x1xf32>
      %cst_111 = arith.constant 9.99999996E-13 : f32
      %275 = vector.broadcast %cst_111 : f32 to vector<16x1xf32>
      %276 = arith.addf %274, %275 : vector<16x1xf32>
      %277 = math.rsqrt %276 : vector<16x1xf32>
      %278 = vector.broadcast %277 : vector<16x1xf32> to vector<16x128xf32>
      %279 = arith.mulf %269, %278 : vector<16x128xf32>
      %280 = vector.broadcast %262 : vector<1x128xf32> to vector<16x128xf32>
      %281 = arith.mulf %279, %280 : vector<16x128xf32>
      %282 = vector.broadcast %263 : vector<1x128xf32> to vector<16x128xf32>
      %283 = arith.addf %281, %282 : vector<16x128xf32>
      %c0_112 = arith.constant 0 : index
      %c0_113 = arith.constant 0 : index
      %284 = vector.load %arg22[%c0_112, %c0_113] : memref<16x128xf32, #tpu.memory_space<vmem>>, vector<16x128xf32>
      tpu.vector_store %arg22[%c0_112, %c0_113], %283 {strides = array<i32>} : memref<16x128xf32, #tpu.memory_space<vmem>>, vector<16x128xf32>,
    } else {
    }
    %c0 = arith.constant 0 : index
    %c0_1 = arith.constant 0 : index
    %3 = vector.load %arg22[%c0, %c0_1] : memref<16x128xf32, #tpu.memory_space<vmem>>, vector<16x128xf32>
    %4 = arith.truncf %3 : vector<16x128xf32> to vector<16x128xbf16>
    %c0_2 = arith.constant 0 : index
    %c0_3 = arith.constant 0 : index
    %c0_4 = arith.constant 0 : index
    %5 = vector.load %arg5[%c0_2, %c0_3, %c0_4] : memref<1x128x384xbf16, #tpu.memory_space<vmem>>, vector<1x128x384xbf16>
    %6 = vector.shape_cast %5 : vector<1x128x384xbf16> to vector<128x384xbf16>
    %cst = arith.constant dense<0.000000e+00> : vector<16x384xf32>
    %7 = tpu.matmul %4, %6, %cst {dimension_numbers = #tpu.dot_dimension_numbers<[1], [0], [0], [1], [0, 0, 1, 1], [], []>} : vector<16x128xbf16>, vector<128x384xbf16>, vector<16x384xf32> -> vector<16x384xf32>
    %c0_5 = arith.constant 0 : index
    %c0_6 = arith.constant 0 : index
    %c0_7 = arith.constant 0 : index
    %8 = vector.load %arg6[%c0_5, %c0_6, %c0_7] : memref<1x1x384xf32, #tpu.memory_space<vmem>>, vector<1x1x384xf32>
    %9 = vector.shape_cast %8 : vector<1x1x384xf32> to vector<1x384xf32>
    %10 = vector.broadcast %9 : vector<1x384xf32> to vector<16x384xf32>
    %11 = arith.addf %7, %10 : vector<16x384xf32>
    %12 = arith.truncf %11 : vector<16x384xf32> to vector<16x384xbf16>
    %c0_8 = arith.constant 0 : index
    %c0_9 = arith.constant 0 : index
    %13 = vector.load %arg2[%c0_8, %c0_9] : memref<2x8xf32, #tpu.memory_space<vmem>>, vector<1x8xf32>
    %14 = vector.extract_strided_slice %12 {offsets = [0, 0], sizes = [8, 32], strides = [1, 1]} : vector<16x384xbf16> to vector<8x32xbf16>
    %15 = vector.extract_strided_slice %12 {offsets = [0, 128], sizes = [8, 32], strides = [1, 1]} : vector<16x384xbf16> to vector<8x32xbf16>
    %16 = vector.extract_strided_slice %12 {offsets = [0, 256], sizes = [8, 32], strides = [1, 1]} : vector<16x384xbf16> to vector<8x32xbf16>
    %cst_10 = arith.constant dense<0.000000e+00> : vector<8x8xf32>
    %17 = tpu.matmul %14, %15, %cst_10 {dimension_numbers = #tpu.dot_dimension_numbers<[1], [1], [0], [0], [0, 0, 1, 0], [], []>} : vector<8x32xbf16>, vector<8x32xbf16>, vector<8x8xf32> -> vector<8x8xf32>
    %cst_11 = arith.constant 0.176776692 : f32
    %18 = vector.broadcast %cst_11 : f32 to vector<8x8xf32>
    %19 = arith.mulf %17, %18 : vector<8x8xf32>
    %20 = vector.broadcast %13 : vector<1x8xf32> to vector<8x8xf32>
    %21 = arith.addf %19, %20 : vector<8x8xf32>
    %cst_12 = arith.constant dense<0xFF800000> : vector<8xf32>
    %22 = vector.multi_reduction <maximumf>, %21, %cst_12 [1] : vector<8x8xf32> to vector<8xf32>
    %23 = vector.shape_cast %22 : vector<8xf32> to vector<8x1xf32>
    %24 = vector.broadcast %23 : vector<8x1xf32> to vector<8x8xf32>
    %25 = arith.subf %21, %24 : vector<8x8xf32>
    %26 = math.exp %25 : vector<8x8xf32>
    %cst_13 = arith.constant dense<0.000000e+00> : vector<8xf32>
    %27 = vector.multi_reduction <add>, %26, %cst_13 [1] : vector<8x8xf32> to vector<8xf32>
    %28 = vector.shape_cast %27 : vector<8xf32> to vector<8x1xf32>
    %29 = vector.broadcast %28 : vector<8x1xf32> to vector<8x8xf32>
    %30 = arith.divf %26, %29 : vector<8x8xf32>
    %31 = arith.truncf %30 : vector<8x8xf32> to vector<8x8xbf16>
    %cst_14 = arith.constant dense<0.000000e+00> : vector<8x32xf32>
    %32 = tpu.matmul %31, %16, %cst_14 {dimension_numbers = #tpu.dot_dimension_numbers<[1], [0], [0], [1], [0, 0, 1, 1], [], []>} : vector<8x8xbf16>, vector<8x32xbf16>, vector<8x32xf32> -> vector<8x32xf32>
    %33 = vector.extract_strided_slice %12 {offsets = [0, 32], sizes = [8, 32], strides = [1, 1]} : vector<16x384xbf16> to vector<8x32xbf16>
    %34 = vector.extract_strided_slice %12 {offsets = [0, 160], sizes = [8, 32], strides = [1, 1]} : vector<16x384xbf16> to vector<8x32xbf16>
    %35 = vector.extract_strided_slice %12 {offsets = [0, 288], sizes = [8, 32], strides = [1, 1]} : vector<16x384xbf16> to vector<8x32xbf16>
    %cst_15 = arith.constant dense<0.000000e+00> : vector<8x8xf32>
    %36 = tpu.matmul %33, %34, %cst_15 {dimension_numbers = #tpu.dot_dimension_numbers<[1], [1], [0], [0], [0, 0, 1, 0], [], []>} : vector<8x32xbf16>, vector<8x32xbf16>, vector<8x8xf32> -> vector<8x8xf32>
    %cst_16 = arith.constant 0.176776692 : f32
    %37 = vector.broadcast %cst_16 : f32 to vector<8x8xf32>
    %38 = arith.mulf %36, %37 : vector<8x8xf32>
    %39 = vector.broadcast %13 : vector<1x8xf32> to vector<8x8xf32>
    %40 = arith.addf %38, %39 : vector<8x8xf32>
    %cst_17 = arith.constant dense<0xFF800000> : vector<8xf32>
    %41 = vector.multi_reduction <maximumf>, %40, %cst_17 [1] : vector<8x8xf32> to vector<8xf32>
    %42 = vector.shape_cast %41 : vector<8xf32> to vector<8x1xf32>
    %43 = vector.broadcast %42 : vector<8x1xf32> to vector<8x8xf32>
    %44 = arith.subf %40, %43 : vector<8x8xf32>
    %45 = math.exp %44 : vector<8x8xf32>
    %cst_18 = arith.constant dense<0.000000e+00> : vector<8xf32>
    %46 = vector.multi_reduction <add>, %45, %cst_18 [1] : vector<8x8xf32> to vector<8xf32>
    %47 = vector.shape_cast %46 : vector<8xf32> to vector<8x1xf32>
    %48 = vector.broadcast %47 : vector<8x1xf32> to vector<8x8xf32>
    %49 = arith.divf %45, %48 : vector<8x8xf32>
    %50 = arith.truncf %49 : vector<8x8xf32> to vector<8x8xbf16>
    %cst_19 = arith.constant dense<0.000000e+00> : vector<8x32xf32>
    %51 = tpu.matmul %50, %35, %cst_19 {dimension_numbers = #tpu.dot_dimension_numbers<[1], [0], [0], [1], [0, 0, 1, 1], [], []>} : vector<8x8xbf16>, vector<8x32xbf16>, vector<8x32xf32> -> vector<8x32xf32>
    %52 = vector.extract_strided_slice %12 {offsets = [0, 64], sizes = [8, 32], strides = [1, 1]} : vector<16x384xbf16> to vector<8x32xbf16>
    %53 = vector.extract_strided_slice %12 {offsets = [0, 192], sizes = [8, 32], strides = [1, 1]} : vector<16x384xbf16> to vector<8x32xbf16>
    %54 = vector.extract_strided_slice %12 {offsets = [0, 320], sizes = [8, 32], strides = [1, 1]} : vector<16x384xbf16> to vector<8x32xbf16>
    %cst_20 = arith.constant dense<0.000000e+00> : vector<8x8xf32>
    %55 = tpu.matmul %52, %53, %cst_20 {dimension_numbers = #tpu.dot_dimension_numbers<[1], [1], [0], [0], [0, 0, 1, 0], [], []>} : vector<8x32xbf16>, vector<8x32xbf16>, vector<8x8xf32> -> vector<8x8xf32>
    %cst_21 = arith.constant 0.176776692 : f32
    %56 = vector.broadcast %cst_21 : f32 to vector<8x8xf32>
    %57 = arith.mulf %55, %56 : vector<8x8xf32>
    %58 = vector.broadcast %13 : vector<1x8xf32> to vector<8x8xf32>
    %59 = arith.addf %57, %58 : vector<8x8xf32>
    %cst_22 = arith.constant dense<0xFF800000> : vector<8xf32>
    %60 = vector.multi_reduction <maximumf>, %59, %cst_22 [1] : vector<8x8xf32> to vector<8xf32>
    %61 = vector.shape_cast %60 : vector<8xf32> to vector<8x1xf32>
    %62 = vector.broadcast %61 : vector<8x1xf32> to vector<8x8xf32>
    %63 = arith.subf %59, %62 : vector<8x8xf32>
    %64 = math.exp %63 : vector<8x8xf32>
    %cst_23 = arith.constant dense<0.000000e+00> : vector<8xf32>
    %65 = vector.multi_reduction <add>, %64, %cst_23 [1] : vector<8x8xf32> to vector<8xf32>
    %66 = vector.shape_cast %65 : vector<8xf32> to vector<8x1xf32>
    %67 = vector.broadcast %66 : vector<8x1xf32> to vector<8x8xf32>
    %68 = arith.divf %64, %67 : vector<8x8xf32>
    %69 = arith.truncf %68 : vector<8x8xf32> to vector<8x8xbf16>
    %cst_24 = arith.constant dense<0.000000e+00> : vector<8x32xf32>
    %70 = tpu.matmul %69, %54, %cst_24 {dimension_numbers = #tpu.dot_dimension_numbers<[1], [0], [0], [1], [0, 0, 1, 1], [], []>} : vector<8x8xbf16>, vector<8x32xbf16>, vector<8x32xf32> -> vector<8x32xf32>
    %71 = vector.extract_strided_slice %12 {offsets = [0, 96], sizes = [8, 32], strides = [1, 1]} : vector<16x384xbf16> to vector<8x32xbf16>
    %72 = vector.extract_strided_slice %12 {offsets = [0, 224], sizes = [8, 32], strides = [1, 1]} : vector<16x384xbf16> to vector<8x32xbf16>
    %73 = vector.extract_strided_slice %12 {offsets = [0, 352], sizes = [8, 32], strides = [1, 1]} : vector<16x384xbf16> to vector<8x32xbf16>
    %cst_25 = arith.constant dense<0.000000e+00> : vector<8x8xf32>
    %74 = tpu.matmul %71, %72, %cst_25 {dimension_numbers = #tpu.dot_dimension_numbers<[1], [1], [0], [0], [0, 0, 1, 0], [], []>} : vector<8x32xbf16>, vector<8x32xbf16>, vector<8x8xf32> -> vector<8x8xf32>
    %cst_26 = arith.constant 0.176776692 : f32
    %75 = vector.broadcast %cst_26 : f32 to vector<8x8xf32>
    %76 = arith.mulf %74, %75 : vector<8x8xf32>
    %77 = vector.broadcast %13 : vector<1x8xf32> to vector<8x8xf32>
    %78 = arith.addf %76, %77 : vector<8x8xf32>
    %cst_27 = arith.constant dense<0xFF800000> : vector<8xf32>
    %79 = vector.multi_reduction <maximumf>, %78, %cst_27 [1] : vector<8x8xf32> to vector<8xf32>
    %80 = vector.shape_cast %79 : vector<8xf32> to vector<8x1xf32>
    %81 = vector.broadcast %80 : vector<8x1xf32> to vector<8x8xf32>
    %82 = arith.subf %78, %81 : vector<8x8xf32>
    %83 = math.exp %82 : vector<8x8xf32>
    %cst_28 = arith.constant dense<0.000000e+00> : vector<8xf32>
    %84 = vector.multi_reduction <add>, %83, %cst_28 [1] : vector<8x8xf32> to vector<8xf32>
    %85 = vector.shape_cast %84 : vector<8xf32> to vector<8x1xf32>
    %86 = vector.broadcast %85 : vector<8x1xf32> to vector<8x8xf32>
    %87 = arith.divf %83, %86 : vector<8x8xf32>
    %88 = arith.truncf %87 : vector<8x8xf32> to vector<8x8xbf16>
    %cst_29 = arith.constant dense<0.000000e+00> : vector<8x32xf32>
    %89 = tpu.matmul %88, %73, %cst_29 {dimension_numbers = #tpu.dot_dimension_numbers<[1], [0], [0], [1], [0, 0, 1, 1], [], []>} : vector<8x8xbf16>, vector<8x32xbf16>, vector<8x32xf32> -> vector<8x32xf32>
    %90 = tpu.concatenate %32, %51, %70, %89 in 1 : vector<8x32xf32>, vector<8x32xf32>, vector<8x32xf32>, vector<8x32xf32> -> vector<8x128xf32>
    %c1 = arith.constant 1 : index
    %c0_30 = arith.constant 0 : index
    %91 = vector.load %arg2[%c1, %c0_30] : memref<2x8xf32, #tpu.memory_space<vmem>>, vector<1x8xf32>
    %92 = vector.extract_strided_slice %12 {offsets = [8, 0], sizes = [8, 32], strides = [1, 1]} : vector<16x384xbf16> to vector<8x32xbf16>
    %93 = vector.extract_strided_slice %12 {offsets = [8, 128], sizes = [8, 32], strides = [1, 1]} : vector<16x384xbf16> to vector<8x32xbf16>
    %94 = vector.extract_strided_slice %12 {offsets = [8, 256], sizes = [8, 32], strides = [1, 1]} : vector<16x384xbf16> to vector<8x32xbf16>
    %cst_31 = arith.constant dense<0.000000e+00> : vector<8x8xf32>
    %95 = tpu.matmul %92, %93, %cst_31 {dimension_numbers = #tpu.dot_dimension_numbers<[1], [1], [0], [0], [0, 0, 1, 0], [], []>} : vector<8x32xbf16>, vector<8x32xbf16>, vector<8x8xf32> -> vector<8x8xf32>
    %cst_32 = arith.constant 0.176776692 : f32
    %96 = vector.broadcast %cst_32 : f32 to vector<8x8xf32>
    %97 = arith.mulf %95, %96 : vector<8x8xf32>
    %98 = vector.broadcast %91 : vector<1x8xf32> to vector<8x8xf32>
    %99 = arith.addf %97, %98 : vector<8x8xf32>
    %cst_33 = arith.constant dense<0xFF800000> : vector<8xf32>
    %100 = vector.multi_reduction <maximumf>, %99, %cst_33 [1] : vector<8x8xf32> to vector<8xf32>
    %101 = vector.shape_cast %100 : vector<8xf32> to vector<8x1xf32>
    %102 = vector.broadcast %101 : vector<8x1xf32> to vector<8x8xf32>
    %103 = arith.subf %99, %102 : vector<8x8xf32>
    %104 = math.exp %103 : vector<8x8xf32>
    %cst_34 = arith.constant dense<0.000000e+00> : vector<8xf32>
    %105 = vector.multi_reduction <add>, %104, %cst_34 [1] : vector<8x8xf32> to vector<8xf32>
    %106 = vector.shape_cast %105 : vector<8xf32> to vector<8x1xf32>
    %107 = vector.broadcast %106 : vector<8x1xf32> to vector<8x8xf32>
    %108 = arith.divf %104, %107 : vector<8x8xf32>
    %109 = arith.truncf %108 : vector<8x8xf32> to vector<8x8xbf16>
    %cst_35 = arith.constant dense<0.000000e+00> : vector<8x32xf32>
    %110 = tpu.matmul %109, %94, %cst_35 {dimension_numbers = #tpu.dot_dimension_numbers<[1], [0], [0], [1], [0, 0, 1, 1], [], []>} : vector<8x8xbf16>, vector<8x32xbf16>, vector<8x32xf32> -> vector<8x32xf32>
    %111 = vector.extract_strided_slice %12 {offsets = [8, 32], sizes = [8, 32], strides = [1, 1]} : vector<16x384xbf16> to vector<8x32xbf16>
    %112 = vector.extract_strided_slice %12 {offsets = [8, 160], sizes = [8, 32], strides = [1, 1]} : vector<16x384xbf16> to vector<8x32xbf16>
    %113 = vector.extract_strided_slice %12 {offsets = [8, 288], sizes = [8, 32], strides = [1, 1]} : vector<16x384xbf16> to vector<8x32xbf16>
    %cst_36 = arith.constant dense<0.000000e+00> : vector<8x8xf32>
    %114 = tpu.matmul %111, %112, %cst_36 {dimension_numbers = #tpu.dot_dimension_numbers<[1], [1], [0], [0], [0, 0, 1, 0], [], []>} : vector<8x32xbf16>, vector<8x32xbf16>, vector<8x8xf32> -> vector<8x8xf32>
    %cst_37 = arith.constant 0.176776692 : f32
    %115 = vector.broadcast %cst_37 : f32 to vector<8x8xf32>
    %116 = arith.mulf %114, %115 : vector<8x8xf32>
    %117 = vector.broadcast %91 : vector<1x8xf32> to vector<8x8xf32>
    %118 = arith.addf %116, %117 : vector<8x8xf32>
    %cst_38 = arith.constant dense<0xFF800000> : vector<8xf32>
    %119 = vector.multi_reduction <maximumf>, %118, %cst_38 [1] : vector<8x8xf32> to vector<8xf32>
    %120 = vector.shape_cast %119 : vector<8xf32> to vector<8x1xf32>
    %121 = vector.broadcast %120 : vector<8x1xf32> to vector<8x8xf32>
    %122 = arith.subf %118, %121 : vector<8x8xf32>
    %123 = math.exp %122 : vector<8x8xf32>
    %cst_39 = arith.constant dense<0.000000e+00> : vector<8xf32>
    %124 = vector.multi_reduction <add>, %123, %cst_39 [1] : vector<8x8xf32> to vector<8xf32>
    %125 = vector.shape_cast %124 : vector<8xf32> to vector<8x1xf32>
    %126 = vector.broadcast %125 : vector<8x1xf32> to vector<8x8xf32>
    %127 = arith.divf %123, %126 : vector<8x8xf32>
    %128 = arith.truncf %127 : vector<8x8xf32> to vector<8x8xbf16>
    %cst_40 = arith.constant dense<0.000000e+00> : vector<8x32xf32>
    %129 = tpu.matmul %128, %113, %cst_40 {dimension_numbers = #tpu.dot_dimension_numbers<[1], [0], [0], [1], [0, 0, 1, 1], [], []>} : vector<8x8xbf16>, vector<8x32xbf16>, vector<8x32xf32> -> vector<8x32xf32>
    %130 = vector.extract_strided_slice %12 {offsets = [8, 64], sizes = [8, 32], strides = [1, 1]} : vector<16x384xbf16> to vector<8x32xbf16>
    %131 = vector.extract_strided_slice %12 {offsets = [8, 192], sizes = [8, 32], strides = [1, 1]} : vector<16x384xbf16> to vector<8x32xbf16>
    %132 = vector.extract_strided_slice %12 {offsets = [8, 320], sizes = [8, 32], strides = [1, 1]} : vector<16x384xbf16> to vector<8x32xbf16>
    %cst_41 = arith.constant dense<0.000000e+00> : vector<8x8xf32>
    %133 = tpu.matmul %130, %131, %cst_41 {dimension_numbers = #tpu.dot_dimension_numbers<[1], [1], [0], [0], [0, 0, 1, 0], [], []>} : vector<8x32xbf16>, vector<8x32xbf16>, vector<8x8xf32> -> vector<8x8xf32>
    %cst_42 = arith.constant 0.176776692 : f32
    %134 = vector.broadcast %cst_42 : f32 to vector<8x8xf32>
    %135 = arith.mulf %133, %134 : vector<8x8xf32>
    %136 = vector.broadcast %91 : vector<1x8xf32> to vector<8x8xf32>
    %137 = arith.addf %135, %136 : vector<8x8xf32>
    %cst_43 = arith.constant dense<0xFF800000> : vector<8xf32>
    %138 = vector.multi_reduction <maximumf>, %137, %cst_43 [1] : vector<8x8xf32> to vector<8xf32>
    %139 = vector.shape_cast %138 : vector<8xf32> to vector<8x1xf32>
    %140 = vector.broadcast %139 : vector<8x1xf32> to vector<8x8xf32>
    %141 = arith.subf %137, %140 : vector<8x8xf32>
    %142 = math.exp %141 : vector<8x8xf32>
    %cst_44 = arith.constant dense<0.000000e+00> : vector<8xf32>
    %143 = vector.multi_reduction <add>, %142, %cst_44 [1] : vector<8x8xf32> to vector<8xf32>
    %144 = vector.shape_cast %143 : vector<8xf32> to vector<8x1xf32>
    %145 = vector.broadcast %144 : vector<8x1xf32> to vector<8x8xf32>
    %146 = arith.divf %142, %145 : vector<8x8xf32>
    %147 = arith.truncf %146 : vector<8x8xf32> to vector<8x8xbf16>
    %cst_45 = arith.constant dense<0.000000e+00> : vector<8x32xf32>
    %148 = tpu.matmul %147, %132, %cst_45 {dimension_numbers = #tpu.dot_dimension_numbers<[1], [0], [0], [1], [0, 0, 1, 1], [], []>} : vector<8x8xbf16>, vector<8x32xbf16>, vector<8x32xf32> -> vector<8x32xf32>
    %149 = vector.extract_strided_slice %12 {offsets = [8, 96], sizes = [8, 32], strides = [1, 1]} : vector<16x384xbf16> to vector<8x32xbf16>
    %150 = vector.extract_strided_slice %12 {offsets = [8, 224], sizes = [8, 32], strides = [1, 1]} : vector<16x384xbf16> to vector<8x32xbf16>
    %151 = vector.extract_strided_slice %12 {offsets = [8, 352], sizes = [8, 32], strides = [1, 1]} : vector<16x384xbf16> to vector<8x32xbf16>
    %cst_46 = arith.constant dense<0.000000e+00> : vector<8x8xf32>
    %152 = tpu.matmul %149, %150, %cst_46 {dimension_numbers = #tpu.dot_dimension_numbers<[1], [1], [0], [0], [0, 0, 1, 0], [], []>} : vector<8x32xbf16>, vector<8x32xbf16>, vector<8x8xf32> -> vector<8x8xf32>
    %cst_47 = arith.constant 0.176776692 : f32
    %153 = vector.broadcast %cst_47 : f32 to vector<8x8xf32>
    %154 = arith.mulf %152, %153 : vector<8x8xf32>
    %155 = vector.broadcast %91 : vector<1x8xf32> to vector<8x8xf32>
    %156 = arith.addf %154, %155 : vector<8x8xf32>
    %cst_48 = arith.constant dense<0xFF800000> : vector<8xf32>
    %157 = vector.multi_reduction <maximumf>, %156, %cst_48 [1] : vector<8x8xf32> to vector<8xf32>
    %158 = vector.shape_cast %157 : vector<8xf32> to vector<8x1xf32>
    %159 = vector.broadcast %158 : vector<8x1xf32> to vector<8x8xf32>
    %160 = arith.subf %156, %159 : vector<8x8xf32>
    %161 = math.exp %160 : vector<8x8xf32>
    %cst_49 = arith.constant dense<0.000000e+00> : vector<8xf32>
    %162 = vector.multi_reduction <add>, %161, %cst_49 [1] : vector<8x8xf32> to vector<8xf32>
    %163 = vector.shape_cast %162 : vector<8xf32> to vector<8x1xf32>
    %164 = vector.broadcast %163 : vector<8x1xf32> to vector<8x8xf32>
    %165 = arith.divf %161, %164 : vector<8x8xf32>
    %166 = arith.truncf %165 : vector<8x8xf32> to vector<8x8xbf16>
    %cst_50 = arith.constant dense<0.000000e+00> : vector<8x32xf32>
    %167 = tpu.matmul %166, %151, %cst_50 {dimension_numbers = #tpu.dot_dimension_numbers<[1], [0], [0], [1], [0, 0, 1, 1], [], []>} : vector<8x8xbf16>, vector<8x32xbf16>, vector<8x32xf32> -> vector<8x32xf32>
    %168 = tpu.concatenate %110, %129, %148, %167 in 1 : vector<8x32xf32>, vector<8x32xf32>, vector<8x32xf32>, vector<8x32xf32> -> vector<8x128xf32>
    %169 = tpu.concatenate %90, %168 in 0 : vector<8x128xf32>, vector<8x128xf32> -> vector<16x128xf32>
    %170 = arith.truncf %169 : vector<16x128xf32> to vector<16x128xbf16>
    %c0_51 = arith.constant 0 : index
    %c0_52 = arith.constant 0 : index
    %c0_53 = arith.constant 0 : index
    %171 = vector.load %arg7[%c0_51, %c0_52, %c0_53] : memref<1x128x128xbf16, #tpu.memory_space<vmem>>, vector<1x128x128xbf16>
    %172 = vector.shape_cast %171 : vector<1x128x128xbf16> to vector<128x128xbf16>
    %cst_54 = arith.constant dense<0.000000e+00> : vector<16x128xf32>
    %173 = tpu.matmul %170, %172, %cst_54 {dimension_numbers = #tpu.dot_dimension_numbers<[1], [0], [0], [1], [0, 0, 1, 1], [], []>} : vector<16x128xbf16>, vector<128x128xbf16>, vector<16x128xf32> -> vector<16x128xf32>
    %c0_55 = arith.constant 0 : index
    %c0_56 = arith.constant 0 : index
    %c0_57 = arith.constant 0 : index
    %174 = vector.load %arg8[%c0_55, %c0_56, %c0_57] : memref<1x1x128xf32, #tpu.memory_space<vmem>>, vector<1x1x128xf32>
    %175 = vector.shape_cast %174 : vector<1x1x128xf32> to vector<1x128xf32>
    %176 = vector.broadcast %175 : vector<1x128xf32> to vector<16x128xf32>
    %177 = arith.addf %173, %176 : vector<16x128xf32>
    %178 = arith.addf %177, %3 : vector<16x128xf32>
    %c0_58 = arith.constant 0 : index
    %c0_59 = arith.constant 0 : index
    %c0_60 = arith.constant 0 : index
    %179 = vector.load %arg9[%c0_58, %c0_59, %c0_60] : memref<1x1x128xf32, #tpu.memory_space<vmem>>, vector<1x1x128xf32>
    %180 = vector.shape_cast %179 : vector<1x1x128xf32> to vector<1x128xf32>
    %c0_61 = arith.constant 0 : index
    %c0_62 = arith.constant 0 : index
    %c0_63 = arith.constant 0 : index
    %181 = vector.load %arg10[%c0_61, %c0_62, %c0_63] : memref<1x1x128xf32, #tpu.memory_space<vmem>>, vector<1x1x128xf32>
    %182 = vector.shape_cast %181 : vector<1x1x128xf32> to vector<1x128xf32>
    %cst_64 = arith.constant dense<0.000000e+00> : vector<16xf32>
    %183 = vector.multi_reduction <add>, %178, %cst_64 [1] : vector<16x128xf32> to vector<16xf32>
    %184 = vector.shape_cast %183 : vector<16xf32> to vector<16x1xf32>
    %cst_65 = arith.constant 1.280000e+02 : f32
    %185 = vector.broadcast %cst_65 : f32 to vector<16x1xf32>
    %186 = arith.divf %184, %185 : vector<16x1xf32>
    %187 = vector.broadcast %186 : vector<16x1xf32> to vector<16x128xf32>
    %188 = arith.subf %178, %187 : vector<16x128xf32>
    %189 = arith.mulf %188, %188 : vector<16x128xf32>
    %cst_66 = arith.constant dense<0.000000e+00> : vector<16xf32>
    %190 = vector.multi_reduction <add>, %189, %cst_66 [1] : vector<16x128xf32> to vector<16xf32>
    %191 = vector.shape_cast %190 : vector<16xf32> to vector<16x1xf32>
    %cst_67 = arith.constant 1.280000e+02 : f32
    %192 = vector.broadcast %cst_67 : f32 to vector<16x1xf32>
    %193 = arith.divf %191, %192 : vector<16x1xf32>
    %cst_68 = arith.constant 9.99999996E-13 : f32
    %194 = vector.broadcast %cst_68 : f32 to vector<16x1xf32>
    %195 = arith.addf %193, %194 : vector<16x1xf32>
    %196 = math.rsqrt %195 : vector<16x1xf32>
    %197 = vector.broadcast %196 : vector<16x1xf32> to vector<16x128xf32>
    %198 = arith.mulf %188, %197 : vector<16x128xf32>
    %199 = vector.broadcast %180 : vector<1x128xf32> to vector<16x128xf32>
    %200 = arith.mulf %198, %199 : vector<16x128xf32>
    %201 = vector.broadcast %182 : vector<1x128xf32> to vector<16x128xf32>
    %202 = arith.addf %200, %201 : vector<16x128xf32>
    %203 = arith.truncf %202 : vector<16x128xf32> to vector<16x128xbf16>
    %c0_69 = arith.constant 0 : index
    %c0_70 = arith.constant 0 : index
    %c0_71 = arith.constant 0 : index
    %204 = vector.load %arg11[%c0_69, %c0_70, %c0_71] : memref<1x128x256xbf16, #tpu.memory_space<vmem>>, vector<1x128x256xbf16>
    %205 = vector.shape_cast %204 : vector<1x128x256xbf16> to vector<128x256xbf16>
    %cst_72 = arith.constant dense<0.000000e+00> : vector<16x256xf32>
    %206 = tpu.matmul %203, %205, %cst_72 {dimension_numbers = #tpu.dot_dimension_numbers<[1], [0], [0], [1], [0, 0, 1, 1], [], []>} : vector<16x128xbf16>, vector<128x256xbf16>, vector<16x256xf32> -> vector<16x256xf32>
    %c0_73 = arith.constant 0 : index
    %c0_74 = arith.constant 0 : index
    %c0_75 = arith.constant 0 : index
    %207 = vector.load %arg12[%c0_73, %c0_74, %c0_75] : memref<1x1x256xf32, #tpu.memory_space<vmem>>, vector<1x1x256xf32>
    %208 = vector.shape_cast %207 : vector<1x1x256xf32> to vector<1x256xf32>
    %209 = vector.broadcast %208 : vector<1x256xf32> to vector<16x256xf32>
    %210 = arith.addf %206, %209 : vector<16x256xf32>
    %cst_76 = arith.constant 5.000000e-01 : f32
    %211 = vector.broadcast %cst_76 : f32 to vector<16x256xf32>
    %212 = arith.mulf %211, %210 : vector<16x256xf32>
    %cst_77 = arith.constant 4.471500e-02 : f32
    %213 = vector.broadcast %cst_77 : f32 to vector<16x256xf32>
    %214 = arith.mulf %213, %210 : vector<16x256xf32>
    %215 = arith.mulf %214, %210 : vector<16x256xf32>
    %216 = arith.mulf %215, %210 : vector<16x256xf32>
    %217 = arith.addf %210, %216 : vector<16x256xf32>
    %cst_78 = arith.constant 0.797884583 : f32
    %218 = vector.broadcast %cst_78 : f32 to vector<16x256xf32>
    %219 = arith.mulf %218, %217 : vector<16x256xf32>
    %220 = math.tanh %219 : vector<16x256xf32>
    %cst_79 = arith.constant 1.000000e+00 : f32
    %221 = vector.broadcast %cst_79 : f32 to vector<16x256xf32>
    %222 = arith.addf %221, %220 : vector<16x256xf32>
    %223 = arith.mulf %212, %222 : vector<16x256xf32>
    %224 = arith.truncf %223 : vector<16x256xf32> to vector<16x256xbf16>
    %c0_80 = arith.constant 0 : index
    %c0_81 = arith.constant 0 : index
    %c0_82 = arith.constant 0 : index
    %225 = vector.load %arg13[%c0_80, %c0_81, %c0_82] : memref<1x256x128xbf16, #tpu.memory_space<vmem>>, vector<1x256x128xbf16>
    %226 = vector.shape_cast %225 : vector<1x256x128xbf16> to vector<256x128xbf16>
    %cst_83 = arith.constant dense<0.000000e+00> : vector<16x128xf32>
    %227 = tpu.matmul %224, %226, %cst_83 {dimension_numbers = #tpu.dot_dimension_numbers<[1], [0], [0], [1], [0, 0, 1, 1], [], []>} : vector<16x256xbf16>, vector<256x128xbf16>, vector<16x128xf32> -> vector<16x128xf32>
    %c0_84 = arith.constant 0 : index
    %c0_85 = arith.constant 0 : index
    %c0_86 = arith.constant 0 : index
    %228 = vector.load %arg14[%c0_84, %c0_85, %c0_86] : memref<1x1x128xf32, #tpu.memory_space<vmem>>, vector<1x1x128xf32>
    %229 = vector.shape_cast %228 : vector<1x1x128xf32> to vector<1x128xf32>
    %230 = vector.broadcast %229 : vector<1x128xf32> to vector<16x128xf32>
    %231 = arith.addf %227, %230 : vector<16x128xf32>
    %232 = arith.addf %231, %202 : vector<16x128xf32>
    %c0_87 = arith.constant 0 : index
    %c0_88 = arith.constant 0 : index
    %c0_89 = arith.constant 0 : index
    %233 = vector.load %arg15[%c0_87, %c0_88, %c0_89] : memref<1x1x128xf32, #tpu.memory_space<vmem>>, vector<1x1x128xf32>
    %234 = vector.shape_cast %233 : vector<1x1x128xf32> to vector<1x128xf32>
    %c0_90 = arith.constant 0 : index
    %c0_91 = arith.constant 0 : index
    %c0_92 = arith.constant 0 : index
    %235 = vector.load %arg16[%c0_90, %c0_91, %c0_92] : memref<1x1x128xf32, #tpu.memory_space<vmem>>, vector<1x1x128xf32>
    %236 = vector.shape_cast %235 : vector<1x1x128xf32> to vector<1x128xf32>
    %cst_93 = arith.constant dense<0.000000e+00> : vector<16xf32>
    %237 = vector.multi_reduction <add>, %232, %cst_93 [1] : vector<16x128xf32> to vector<16xf32>
    %238 = vector.shape_cast %237 : vector<16xf32> to vector<16x1xf32>
    %cst_94 = arith.constant 1.280000e+02 : f32
    %239 = vector.broadcast %cst_94 : f32 to vector<16x1xf32>
    %240 = arith.divf %238, %239 : vector<16x1xf32>
    %241 = vector.broadcast %240 : vector<16x1xf32> to vector<16x128xf32>
    %242 = arith.subf %232, %241 : vector<16x128xf32>
    %243 = arith.mulf %242, %242 : vector<16x128xf32>
    %cst_95 = arith.constant dense<0.000000e+00> : vector<16xf32>
    %244 = vector.multi_reduction <add>, %243, %cst_95 [1] : vector<16x128xf32> to vector<16xf32>
    %245 = vector.shape_cast %244 : vector<16xf32> to vector<16x1xf32>
    %cst_96 = arith.constant 1.280000e+02 : f32
    %246 = vector.broadcast %cst_96 : f32 to vector<16x1xf32>
    %247 = arith.divf %245, %246 : vector<16x1xf32>
    %cst_97 = arith.constant 9.99999996E-13 : f32
    %248 = vector.broadcast %cst_97 : f32 to vector<16x1xf32>
    %249 = arith.addf %247, %248 : vector<16x1xf32>
    %250 = math.rsqrt %249 : vector<16x1xf32>
    %251 = vector.broadcast %250 : vector<16x1xf32> to vector<16x128xf32>
    %252 = arith.mulf %242, %251 : vector<16x128xf32>
    %253 = vector.broadcast %234 : vector<1x128xf32> to vector<16x128xf32>
    %254 = arith.mulf %252, %253 : vector<16x128xf32>
    %255 = vector.broadcast %236 : vector<1x128xf32> to vector<16x128xf32>
    %256 = arith.addf %254, %255 : vector<16x128xf32>
    %c0_98 = arith.constant 0 : index
    %c0_99 = arith.constant 0 : index
    %257 = vector.load %arg22[%c0_98, %c0_99] : memref<16x128xf32, #tpu.memory_space<vmem>>, vector<16x128xf32>
    tpu.vector_store %arg22[%c0_98, %c0_99], %256 {strides = array<i32>} : memref<16x128xf32, #tpu.memory_space<vmem>>, vector<16x128xf32>,
    %c1_i32 = arith.constant 1 : i32
    %258 = arith.cmpi eq, %arg0, %c1_i32 : i32
    %259 = arith.extui %258 : i1 to i32
    %c0_i32_100 = arith.constant 0 : i32
    %260 = arith.cmpi ne, %259, %c0_i32_100 : i32
    scf.if %260 {
      %261 = vector.extract_strided_slice %256 {offsets = [0, 0], sizes = [1, 128], strides = [1, 1]} : vector<16x128xf32> to vector<1x128xf32>
      %262 = vector.extract_strided_slice %256 {offsets = [8, 0], sizes = [1, 128], strides = [1, 1]} : vector<16x128xf32> to vector<1x128xf32>
      %263 = tpu.concatenate %261, %262 in 0 : vector<1x128xf32>, vector<1x128xf32> -> vector<2x128xf32>
      %264 = arith.truncf %263 : vector<2x128xf32> to vector<2x128xbf16>
      %c0_101 = arith.constant 0 : index
      %c0_102 = arith.constant 0 : index
      %265 = vector.load %arg17[%c0_101, %c0_102] : memref<128x128xbf16, #tpu.memory_space<vmem>>, vector<128x128xbf16>
      %cst_103 = arith.constant dense<0.000000e+00> : vector<2x128xf32>
      %266 = tpu.matmul %264, %265, %cst_103 {dimension_numbers = #tpu.dot_dimension_numbers<[1], [0], [0], [1], [0, 0, 1, 1], [], []>} : vector<2x128xbf16>, vector<128x128xbf16>, vector<2x128xf32> -> vector<2x128xf32>
      %c0_104 = arith.constant 0 : index
      %c0_105 = arith.constant 0 : index
      %267 = vector.load %arg18[%c0_104, %c0_105] : memref<1x128xf32, #tpu.memory_space<vmem>>, vector<1x128xf32>
      %268 = vector.broadcast %267 : vector<1x128xf32> to vector<2x128xf32>
      %269 = arith.addf %266, %268 : vector<2x128xf32>
      %270 = math.tanh %269 : vector<2x128xf32>
      %271 = arith.truncf %270 : vector<2x128xf32> to vector<2x128xbf16>
      %c0_106 = arith.constant 0 : index
      %c0_107 = arith.constant 0 : index
      %272 = vector.load %arg19[%c0_106, %c0_107] : memref<128x128xbf16, #tpu.memory_space<vmem>>, vector<128x128xbf16>
      %cst_108 = arith.constant dense<0.000000e+00> : vector<2x128xf32>
      %273 = tpu.matmul %271, %272, %cst_108 {dimension_numbers = #tpu.dot_dimension_numbers<[1], [0], [0], [1], [0, 0, 1, 1], [], []>} : vector<2x128xbf16>, vector<128x128xbf16>, vector<2x128xf32> -> vector<2x128xf32>
      %c0_109 = arith.constant 0 : index
      %c0_110 = arith.constant 0 : index
      %274 = vector.load %arg20[%c0_109, %c0_110] : memref<1x128xf32, #tpu.memory_space<vmem>>, vector<1x128xf32>
      %275 = vector.broadcast %274 : vector<1x128xf32> to vector<2x128xf32>
      %276 = arith.addf %273, %275 : vector<2x128xf32>
      %c0_111 = arith.constant 0 : index
      %c0_112 = arith.constant 0 : index
      %277 = vector.load %arg21[%c0_111, %c0_112] : memref<2x128xf32, #tpu.memory_space<vmem>>, vector<2x128xf32>
      tpu.vector_store %arg21[%c0_111, %c0_112], %276 {strides = array<i32>} : memref<2x128xf32, #tpu.memory_space<vmem>>, vector<2x128xf32>,
    } else {
    }
    return
  }
  func.func @transform_0(%arg0: i32) -> (i32, i32) {
    %c0_i32 = arith.constant 0 : i32
    %c0_i32_0 = arith.constant 0 : i32
    %c0_i32_1 = arith.constant 0 : i32
    return %c0_i32, %c0_i32_0 : i32, i32
  }
  func.func @transform_1(%arg0: i32) -> (i32, i32) {
    %c0_i32 = arith.constant 0 : i32
    %c0_i32_0 = arith.constant 0 : i32
    %c0_i32_1 = arith.constant 0 : i32
    return %c0_i32, %c0_i32_0 : i32, i32
  }
  func.func @transform_2(%arg0: i32) -> (i32, i32) {
    %c0_i32 = arith.constant 0 : i32
    %c0_i32_0 = arith.constant 0 : i32
    %c0_i32_1 = arith.constant 0 : i32
    return %c0_i32, %c0_i32_0 : i32, i32
  }
  func.func @transform_3(%arg0: i32) -> (i32, i32) {
    %c0_i32 = arith.constant 0 : i32
    %c0_i32_0 = arith.constant 0 : i32
    %c0_i32_1 = arith.constant 0 : i32
    return %c0_i32, %c0_i32_0 : i32, i32
  }
  func.func @transform_4(%arg0: i32) -> (i32, i32, i32) {
    %c0_i32 = arith.constant 0 : i32
    %c0_i32_0 = arith.constant 0 : i32
    %c0_i32_1 = arith.constant 0 : i32
    return %arg0, %c0_i32, %c0_i32_0 : i32, i32, i32
  }
  func.func @transform_5(%arg0: i32) -> (i32, i32, i32) {
    %c0_i32 = arith.constant 0 : i32
    %c0_i32_0 = arith.constant 0 : i32
    %c0_i32_1 = arith.constant 0 : i32
    return %arg0, %c0_i32, %c0_i32_0 : i32, i32, i32
  }
  func.func @transform_6(%arg0: i32) -> (i32, i32, i32) {
    %c0_i32 = arith.constant 0 : i32
    %c0_i32_0 = arith.constant 0 : i32
    %c0_i32_1 = arith.constant 0 : i32
    return %arg0, %c0_i32, %c0_i32_0 : i32, i32, i32
  }
  func.func @transform_7(%arg0: i32) -> (i32, i32, i32) {
    %c0_i32 = arith.constant 0 : i32
    %c0_i32_0 = arith.constant 0 : i32
    %c0_i32_1 = arith.constant 0 : i32
    return %arg0, %c0_i32, %c0_i32_0 : i32, i32, i32
  }
  func.func @transform_8(%arg0: i32) -> (i32, i32, i32) {
    %c0_i32 = arith.constant 0 : i32
    %c0_i32_0 = arith.constant 0 : i32
    %c0_i32_1 = arith.constant 0 : i32
    return %arg0, %c0_i32, %c0_i32_0 : i32, i32, i32
  }
  func.func @transform_9(%arg0: i32) -> (i32, i32, i32) {
    %c0_i32 = arith.constant 0 : i32
    %c0_i32_0 = arith.constant 0 : i32
    %c0_i32_1 = arith.constant 0 : i32
    return %arg0, %c0_i32, %c0_i32_0 : i32, i32, i32
  }
  func.func @transform_10(%arg0: i32) -> (i32, i32, i32) {
    %c0_i32 = arith.constant 0 : i32
    %c0_i32_0 = arith.constant 0 : i32
    %c0_i32_1 = arith.constant 0 : i32
    return %arg0, %c0_i32, %c0_i32_0 : i32, i32, i32
  }
  func.func @transform_11(%arg0: i32) -> (i32, i32, i32) {
    %c0_i32 = arith.constant 0 : i32
    %c0_i32_0 = arith.constant 0 : i32
    %c0_i32_1 = arith.constant 0 : i32
    return %arg0, %c0_i32, %c0_i32_0 : i32, i32, i32
  }
  func.func @transform_12(%arg0: i32) -> (i32, i32, i32) {
    %c0_i32 = arith.constant 0 : i32
    %c0_i32_0 = arith.constant 0 : i32
    %c0_i32_1 = arith.constant 0 : i32
    return %arg0, %c0_i32, %c0_i32_0 : i32, i32, i32
  }
  func.func @transform_13(%arg0: i32) -> (i32, i32, i32) {
    %c0_i32 = arith.constant 0 : i32
    %c0_i32_0 = arith.constant 0 : i32
    %c0_i32_1 = arith.constant 0 : i32
    return %arg0, %c0_i32, %c0_i32_0 : i32, i32, i32
  }
  func.func @transform_14(%arg0: i32) -> (i32, i32, i32) {
    %c0_i32 = arith.constant 0 : i32
    %c0_i32_0 = arith.constant 0 : i32
    %c0_i32_1 = arith.constant 0 : i32
    return %arg0, %c0_i32, %c0_i32_0 : i32, i32, i32
  }
  func.func @transform_15(%arg0: i32) -> (i32, i32, i32) {
    %c0_i32 = arith.constant 0 : i32
    %c0_i32_0 = arith.constant 0 : i32
    %c0_i32_1 = arith.constant 0 : i32
    return %arg0, %c0_i32, %c0_i32_0 : i32, i32, i32
  }
  func.func @transform_16(%arg0: i32) -> (i32, i32) {
    %c0_i32 = arith.constant 0 : i32
    %c0_i32_0 = arith.constant 0 : i32
    %c0_i32_1 = arith.constant 0 : i32
    return %c0_i32, %c0_i32_0 : i32, i32
  }
  func.func @transform_17(%arg0: i32) -> (i32, i32) {
    %c0_i32 = arith.constant 0 : i32
    %c0_i32_0 = arith.constant 0 : i32
    %c0_i32_1 = arith.constant 0 : i32
    return %c0_i32, %c0_i32_0 : i32, i32
  }
  func.func @transform_18(%arg0: i32) -> (i32, i32) {
    %c0_i32 = arith.constant 0 : i32
    %c0_i32_0 = arith.constant 0 : i32
    %c0_i32_1 = arith.constant 0 : i32
    return %c0_i32, %c0_i32_0 : i32, i32
  }
  func.func @transform_19(%arg0: i32) -> (i32, i32) {
    %c0_i32 = arith.constant 0 : i32
    %c0_i32_0 = arith.constant 0 : i32
    %c0_i32_1 = arith.constant 0 : i32
    return %c0_i32, %c0_i32_0 : i32, i32
  }
  func.func @transform_20(%arg0: i32) -> (i32, i32) {
    %c0_i32 = arith.constant 0 : i32
    %c0_i32_0 = arith.constant 0 : i32
    %c0_i32_1 = arith.constant 0 : i32
    return %c0_i32, %c0_i32_0 : i32, i32
  }
}

</mosaic_0001>

<bundles_post_ra>
// kernel: bert_finetune_forward.1
= control target key start
LH: loop header
LB: loop body
LE: loop exit
PB: predicated region body
PF: predicated region fallthrough
CT: control target
= control target key end

     0   :  { %s4276_s0 = inlined_call_operand.vmem [shape: f32[16,128], index: 0, kind: input, shape index: {}]   ;;  %s4277_s1 = inlined_call_operand.vmem [shape: f32[2,8], index: 1, kind: input, shape index: {}]   ;;  %s4278_s2 = inlined_call_operand.vmem [shape: f32[1,128], index: 2, kind: input, shape index: {}]   ;;  %s4279_s3 = inlined_call_operand.vmem [shape: f32[1,128], index: 3, kind: input, shape index: {}]   ;;  %s4280_s4 = inlined_call_operand.hbm [shape: bf16[2,128,384], index: 4, kind: input, shape index: {}]   ;;  %s4281_s5 = inlined_call_operand.vmem [shape: f32[2,1,384], index: 5, kind: input, shape index: {}]   ;;  %s4282_s6 = inlined_call_operand.vmem [shape: bf16[2,128,128], index: 6, kind: input, shape index: {}]   ;;  %s4283_s7 = inlined_call_operand.vmem [shape: f32[2,1,128], index: 7, kind: input, shape index: {}]   ;;  %s4284_s8 = inlined_call_operand.vmem [shape: f32[2,1,128], index: 8, kind: input, shape index: {}]   ;;  %s4285_s9 = inlined_call_operand.vmem [shape: f32[2,1,128], index: 9, kind: input, shape index: {}]   ;;  %s4286_s10 = inlined_call_operand.hbm [shape: bf16[2,128,256], index: 10, kind: input, shape index: {}]   ;;  %s4287_s11 = inlined_call_operand.vmem [shape: f32[2,1,256], index: 11, kind: input, shape index: {}]   ;;  %s4288_s12 = inlined_call_operand.hbm [shape: bf16[2,256,128], index: 12, kind: input, shape index: {}]   ;;  %s4289_s13 = inlined_call_operand.vmem [shape: f32[2,1,128], index: 13, kind: input, shape index: {}]   ;;  %s4290_s14 = inlined_call_operand.vmem [shape: f32[2,1,128], index: 14, kind: input, shape index: {}]   ;;  %s4291_s15 = inlined_call_operand.vmem [shape: f32[2,1,128], index: 15, kind: input, shape index: {}]   ;;  %s4292_s16 = inlined_call_operand.hbm [shape: bf16[128,128], index: 16, kind: input, shape index: {}]   ;;  %s4293_s17 = inlined_call_operand.vmem [shape: f32[1,128], index: 17, kind: input, shape index: {}]   ;;  %s4294_s18 = inlined_call_operand.hbm [shape: bf16[128,128], index: 18, kind: input, shape index: {}]   ;;  %s4295_s19 = inlined_call_operand.vmem [shape: f32[1,128], index: 19, kind: input, shape index: {}]   ;;  %s4296_s20 = inlined_call_operand.hbm [shape: f32[2,128], index: 20, kind: output, shape index: {}]  }
   0x1   :  { %4308 = sst [smem:[#allocation20_spill]] %s4276_s0 }
   0x2   :  { %4309 = sst [smem:[#allocation21_spill]] %s4277_s1 }
   0x3   :  { %4310 = sst [smem:[#allocation22_spill]] %s4278_s2 }
   0x4   :  { %4311 = sst [smem:[#allocation23_spill]] %s4279_s3 }
   0x5   :  { %4312 = sst [smem:[#allocation24_spill]] %s4280_s4 }
   0x6   :  { %4313 = sst [smem:[#allocation25_spill]] %s4281_s5 }
   0x7   :  { %4314 = sst [smem:[#allocation26_spill]] %s4282_s6 }
   0x8   :  { %4315 = sst [smem:[#allocation27_spill]] %s4284_s8 }
   0x9   :  { %4316 = sst [smem:[#allocation28_spill]] %s4285_s9 }
   0xa   :  { %4317 = sst [smem:[#allocation29_spill]] %s4286_s10 }
   0xb   :  { %4318 = sst [smem:[#allocation30_spill]] %s4287_s11 }
   0xc   :  { %4319 = sst [smem:[#allocation31_spill]] %s4288_s12 }
   0xd   :  { %4320 = sst [smem:[#allocation32_spill]] %s4289_s13 }
   0xe   :  { %4321 = sst [smem:[#allocation33_spill]] %s4290_s14 }
   0xf   :  { %4322 = sst [smem:[#allocation34_spill]] %s4291_s15 }
  0x10   :  { %4323 = sst [smem:[#allocation35_spill]] %s4292_s16 }
  0x11   :  { %4324 = sst [smem:[#allocation36_spill]] %s4293_s17 }
  0x12   :  { %4325 = sst [smem:[#allocation37_spill]] %s4294_s18 }
  0x13   :  { %4326 = sst [smem:[#allocation38_spill]] %s4295_s19 }
  0x14   :  { %4327 = sst [smem:[#allocation39_spill]] %s4296_s20 }
  0x15   :  { %25 = vsyncpa [#allocation4], 0 }
  0x16   :  { %27 = vsyncpa [#allocation4 + $0x1], 0 }
  0x17   :  { %28 = vsyncpa [#allocation7], 0 }
  0x18   :  { %30 = vsyncpa [#allocation7 + $0x1], 0 }
  0x19   :  { %31 = vsyncpa [#allocation10], 0 }
  0x1a   :  { %32 = vsyncpa [#allocation5], 0  ;;  %s3668_s1 = smov 0   ;;  %s3670_s22 = smov 0  }
  0x1b   :  { %s3672_s23 = smov 0   ;;  %s3674_s24 = smov 0  }
  0x1c LB: > { %4328 = sst [smem:[#allocation17_spill]] %s3543_s23  ;;  %s3687_s2 = sadd.s32 4294967295, %s3547_s24   ;;  %s3547_s24 = sphi %s3674_s24, %s4366_s24   ;;  %s3543_s23 = sphi %s3672_s23, %s4368_s23   ;;  %s3539_s22 = sphi %s3670_s22, %s4370_s22   ;;  %s3535_s1 = sphi %s3668_s1, %s4369_s1  }
  0x1d   : > { %p142_p0 = scmp.ne.s32.totalorder %s3539_s22, %s3535_s1  ;;  %p143_p1 = scmp.eq.s32.totalorder %s3687_s2, 0 }
  0x1e   : > { %p2702_p2 = scmp.ge.s32.totalorder %s3547_s24, 1  ;;  %p544_p3 = scmp.lt.s32.totalorder %s3547_s24, 3 }
  0x1f   : > { %p2703_p4 = scmp.ne.s32.totalorder %s3687_s2, 0  ;;  %p3696_p5 = por %p143_p1, %p142_p0 }
  0x20   : > { %s4330_s16 = sld [smem:[#allocation35_spill]]  ;;  %p3703_p6 = pnand %p2702_p2, %p544_p3 }
  0x21   : > { %s3549_s4 = smov [#allocation9]   ;;  %s3716_s0 = sadd.s32 1, %s3547_s24  }
  0x22   : > { %p3168_p7 = pneg %p3703_p6  ;;  %s569_s29 = sshll.u32 %s3549_s4, 4  ;;  %s570_s29 = int_to_ptr.vmem [resolvable:$true] %s569_s29 }
  0x23   : > { %4333 = sst [smem:[#allocation18_spill]] %s3716_s0  ;;  %s4300_s21 = smov 64  }
  0x24   : > { %p3711_p8 = pnand %p3168_p7, %p143_p1  ;;  %s4302_s1 = smov 4  }
  0x25   : > { %s126_s3 = ssub.s32 %s3547_s24, %s3716_s0  ;;  %s129_s26 = sadd.s32 1, %s3543_s23 }
  0x26   : > { %s567_s27 = sshll.u32 %s4330_s16, 4  ;;  %p127_p9 = scmp.eq.s32.totalorder %s126_s3, 0  ;;  %s568_s27 = int_to_ptr.hbm [resolvable:$true] %s567_s27 }
  0x27   : > { %3171 = dma.hbm_to_vmem [thread:$0]  (!%p3711_p8), %s568_s27, 1024, %s570_s29, [#allocation10], %s4300_s21, %s4300_s21, %s4302_s1  }
  0x28   : > { %p136_p10 = scmp.ne.s32.totalorder %s3543_s23, %s3539_s22  ;;  %p137_p11 = scmp.eq.s32.totalorder %s3547_s24, 0 }
  0x29   : > { %p3187_p12 = scmp.lt.s32.totalorder %s3547_s24, 2  ;;  %s3734_s16 = sand.u32 1, %s3543_s23  }
  0x2a   : > { %s3731_s4 = scalar_select %p127_p9, %s3543_s23, %s129_s26  }
  0x2b   : > { %p138_p13 = por %p137_p11, %p136_p10  ;;  %s658_s20 = sand.u32 1, %s3547_s24  }
  0x2c   : > { %4334 = sst [smem:[#allocation19_spill]] %s3731_s4  ;;  %s4307_s19 = sshll.u32 %s3734_s16, 7 }
  0x2d   : > { %p3738_p0 = pnand %p3187_p12, %p138_p13  ;;  %s3063_s27 = sshll.u32 %s3547_s24, 7 }
  0x2e   : > { %s4336_s10 = sld [smem:[#allocation29_spill]]  ;;  %s662_s1 = scalar_lea.vmem [#allocation6], %s4307_s19 }
  0x2f   : > { %s670_s4 = sshll.u32 %s662_s1, 4  ;;  %s3748_s23 = scalar_lea.sflag [#allocation7], %s658_s20  ;;  %s671_s4 = int_to_ptr.vmem [resolvable:$true] %s670_s4 }
  0x30   : > { %p3357_p3 = pneg %p3738_p0 }
  0x34   : > { %s667_s21 = scalar_lea.hbm %s4336_s10, %s3063_s27 }
  0x35   : > { %s668_s26 = sshll.u32 %s667_s21, 4  ;;  %s3360_s21 = scalar_lea.hbm %s4336_s10, 256  ;;  %s669_s26 = int_to_ptr.hbm [resolvable:$true] %s668_s26 }
  0x36   : > { %s3353_s0 = sshra.s32 %s669_s26, 4  ;;  %s3354_s0 = int_to_ptr.hbm [resolvable:$true] %s3353_s0 }
  0x37   : > { %s3355_s15 = scalar_lea.hbm %s3354_s0, 128  ;;  %p3361_p10 = scmp.lt.s32.totalorder %s3354_s0, %s4336_s10 }
  0x38   : > { %p3356_p2 = scmp.ne.s32.totalorder %s3354_s0, %s3355_s15  ;;  %p3362_p11 = scmp.lt.s32.totalorder %s3360_s21, %s3355_s15 }
  0x3a   : > { %p3358_p7 = pnand %p3357_p3, %p3356_p2  ;;  %p3363_p12 = por %p3362_p11, %p3361_p10 }
  0x3c   : > { %p3359_p9 = pneg %p3358_p7 }
  0x3e   : > { %p3364_p13 = pnand %p3363_p12, %p3359_p9 }
  0x40   : > { %3367 = shalt.err (!%p3364_p13)
}
  0x41   : > { %s3552_s20 = smov 128   ;;  %s3553_s14 = smov 8  }
  0x42   : > { %3181 = dma.hbm_to_vmem [thread:$0]  (!%p3738_p0), %s669_s26, 2048, %s671_s4, %s3748_s23, %s3552_s20, %s3552_s20, %s3553_s14  }
  0x43   : > { %s4337_s12 = sld [smem:[#allocation31_spill]]  ;;  %s4338_s15 = sshll.u32 %s3734_s16, 7 }
  0x44   : > { %s691_s0 = scalar_lea.vmem [#allocation8], %s4338_s15  ;;  %s4339_s18 = sld [smem:[#allocation37_spill]] }
  0x45   : > { %s699_s21 = sshll.u32 %s691_s0, 4  ;;  %s3554_s9 = smov [#allocation11]   ;;  %s3774_s21 = int_to_ptr.vmem [resolvable:$true] %s699_s21 }
  0x46   : > { %s586_s8 = sshll.u32 %s3554_s9, 4  ;;  %s4340_s14 = smov 4   ;;  %s587_s8 = int_to_ptr.vmem [resolvable:$true] %s586_s8 }
  0x47   : > { %s3146_s4 = smul.u32 192, %s3734_s16  ;;  %s4342_s29 = sld [smem:[#allocation24_spill]] }
  0x48   : > { %s604_s9 = scalar_lea.sflag [#allocation4], %s3734_s16 }
  0x49   : > { %s696_s13 = scalar_lea.hbm %s4337_s12, %s3063_s27  ;;  %s3147_s27 = smul.u32 192, %s3547_s24 }
  0x4a   : > { %s697_s19 = sshll.u32 %s696_s13, 4  ;;  %s584_s11 = sshll.u32 %s4339_s18, 4  ;;  %s3767_s19 = int_to_ptr.hbm [resolvable:$true] %s697_s19  ;;  %s585_s11 = int_to_ptr.hbm [resolvable:$true] %s584_s11 }
  0x4b   : > { %s4341_s13 = smov 64   ;;  %s607_s3 = scalar_lea.vmem [#allocation3], %s3146_s4 }
  0x4c   : > { %3174 = dma.hbm_to_vmem [thread:$0]  (!%p3711_p8), %s585_s11, 1024, %s587_s8, [#allocation10], %s4341_s13, %s4341_s13, %s4340_s14  }
  0x4d   : > { %s612_s10 = scalar_lea.hbm %s4342_s29, %s3147_s27  ;;  %s615_s15 = sshll.u32 %s607_s3, 4  ;;  %s616_s15 = int_to_ptr.vmem [resolvable:$true] %s615_s15 }
  0x4e   : > { %s613_s0 = sshll.u32 %s612_s10, 4  ;;  %s3420_s24 = scalar_lea.hbm %s4342_s29, 384  ;;  %s614_s0 = int_to_ptr.hbm [resolvable:$true] %s613_s0 }
  0x4f   : > { %s3413_s1 = sshra.s32 %s614_s0, 4  ;;  %s3414_s1 = int_to_ptr.hbm [resolvable:$true] %s3413_s1 }
  0x50   : > { %s3415_s18 = scalar_lea.hbm %s3414_s1, 192  ;;  %p3421_p9 = scmp.lt.s32.totalorder %s3414_s1, %s4342_s29 }
  0x51   : > { %p3416_p2 = scmp.ne.s32.totalorder %s3414_s1, %s3415_s18  ;;  %p3422_p10 = scmp.lt.s32.totalorder %s3420_s24, %s3415_s18 }
  0x53   : > { %p3418_p7 = pnand %p3416_p2, %p3357_p3  ;;  %p3423_p11 = por %p3422_p10, %p3421_p9 }
  0x55   : > { %p3419_p8 = pneg %p3418_p7 }
  0x57   : > { %p3424_p12 = pnand %p3423_p11, %p3419_p8 }
  0x59   : > { %3427 = shalt.err (!%p3424_p12)
}
  0x5a   : > { %s3555_s16 = smov 192   ;;  %s3556_s4 = smov 12  }
  0x5b   : > { %3178 = dma.hbm_to_vmem [thread:$0]  (!%p3738_p0), %s614_s0, 3072, %s616_s15, %s604_s9, %s3555_s16, %s3555_s16, %s3556_s4  }
  0x5c   : > { %s3443_s26 = sshra.s32 %s3767_s19, 4  ;;  %s3450_s3 = scalar_lea.hbm %s4337_s12, 256  ;;  %s3444_s26 = int_to_ptr.hbm [resolvable:$true] %s3443_s26 }
  0x5d   : > { %s3445_s20 = scalar_lea.hbm %s3444_s26, 128  ;;  %p3451_p8 = scmp.lt.s32.totalorder %s3444_s26, %s4337_s12 }
  0x5e   : > { %p3446_p13 = scmp.ne.s32.totalorder %s3444_s26, %s3445_s20  ;;  %p3452_p9 = scmp.lt.s32.totalorder %s3450_s3, %s3445_s20 }
  0x60   : > { %p3448_p2 = pnand %p3446_p13, %p3357_p3  ;;  %p3453_p10 = por %p3452_p9, %p3451_p8 }
  0x62   : > { %p3449_p7 = pneg %p3448_p2 }
  0x64   : > { %p3454_p11 = pnand %p3453_p10, %p3449_p7 }
  0x66   : > { %3457 = shalt.err (!%p3454_p11)
}
  0x67   : > { %3184 = dma.hbm_to_vmem [thread:$0]  (!%p3738_p0), %s3767_s19, 2048, %s3774_s21, %s3748_s23, %s4341_s13, %s4341_s13, %s4340_s14  }
  0x68   : > { %729 = sbr.rel (%p3703_p6) target bundleno = 3127 (0xc37), region = 100  ;;  %s731_s15 = sand.u32 (!%p3703_p6), 1, %s3539_s22  }
  0x69   : > { %s3148_s0 = smul.u32 (!%p3703_p6), 192, %s731_s15  ;;  %s732_s9 = scalar_lea.sflag (!%p3703_p6), [#allocation4], %s731_s15 }
  0x6b   : > { %s3819_s11 = scalar_lea.vmem (!%p3703_p6), [#allocation3], %s3148_s0 }
  0x6d   : > { %3518 = dma.done.wait (%p3696_p5), %s732_s9, 3072  }
  0x6e   : > { %3520 = vsyncadd (%p3696_p5), %s732_s9, 4294964224  ;;  %s741_s17 = sand.u32 1, %s3687_s2   ;;  %s2714_s24 = sshll.u32 %s731_s15, 7 }
  0x6f   : > { %s742_s23 = scalar_lea.sflag [#allocation7], %s741_s17  ;;  %s3826_s19 = scalar_lea.vmem [#allocation6], %s2714_s24 }
  0x70   : > { %3522 = dma.done.wait (%p3696_p5), %s742_s23, 4096  }
  0x71   : > { %3524 = vsyncadd (%p3696_p5), %s742_s23, 4294963200  ;;  %s3832_s28 = scalar_lea.vmem [#allocation8], %s2714_s24 }
  0x72   : > { %3526 = dma.done.wait (%p143_p1), [#allocation10], 2048  }
  0x73   : > { %3528 = vsyncadd (%p143_p1), [#allocation10], 4294965248  ;;  %p859_p6 = scmp.lt.s32.totalorder %s3687_s2, 1  ;;  %s4343_s6 = sld [smem:[#allocation26_spill]] }
  0x74   : > { %s4344_s5 = sld [smem:[#allocation25_spill]] }
  0x75   : > { %s3840_s21 = scalar_select %p859_p6, %s3687_s2, 1 }
  0x76   : > { %s4346_s17 = sld [smem:[#allocation28_spill]] }
  0x77   : > { %s3149_s25 = smul.u32 3, %s3840_s21  ;;  %s3065_s14 = sshll.u32 %s3840_s21, 6 }
  0x78   : > { %s2720_s23 = sshll.u32 %s3840_s21, 1  ;;  %s4347_s30 = sld [smem:[#allocation30_spill]] }
  0x79   : > { %s3847_s27 = scalar_lea.vmem %s4343_s6, %s3065_s14  ;;  %s4348_s26 = sld [smem:[#allocation32_spill]] }
  0x7a   : > { %s3856_s18 = scalar_lea.vmem %s4344_s5, %s3149_s25  ;;  %s4349_s5 = sld [smem:[#allocation33_spill]] }
  0x7b   : > { %s4350_s8 = sld [smem:[#allocation34_spill]] }
  0x7c   : > { %s876_s24 = scalar_lea.vmem %s4346_s17, %s3840_s21  ;;  %s4351_s17 = sld [smem:[#allocation20_spill]] (!%p2703_p4) }
  0x7d   : > { %894 = sbr.rel (%p2703_p4) target bundleno = 406 (0x196), region = 124  ;;  %s4352_s13 = sld [smem:[#allocation22_spill]] (!%p2703_p4) }
  0x7e   : > { %s3870_s6 = scalar_lea.vmem %s4347_s30, %s2720_s23  ;;  %s4353_s4 = sld [smem:[#allocation23_spill]] (!%p2703_p4) }
  0x7f   : > { %s883_s20 = scalar_lea.vmem %s4348_s26, %s3840_s21 }
  0x80   : > { %s886_s12 = scalar_lea.vmem %s4349_s5, %s3840_s21 }
  0x81   : > { %s889_s15 = scalar_lea.vmem %s4350_s8, %s3840_s21 }
  0x82   : > { %v895_v0 = vld [vmem:[%s4351_s17] sm:$0xff]  ;;  %v896_v1 = vld [vmem:[%s4351_s17 + $0x8] sm:$0xff]  ;;  %v3557_v2 = vmov 128.0  }
  0x83   : > { %899 = vadd.xlane.f32.xlu0 %v895_v0  ;;  %3240 = vrcp.f32 %v3557_v2  ;;  %v3238_v31 = vld [vmem:[%s4352_s13] ss:$0 sm:$0xff] }
  0x84   : > { %v3239_v34 = vld [vmem:[%s4353_s4] ss:$0 sm:$0xff] }
  0x89   : > { %v3241_v3 = vpop.eup %3240 }
  0x8a   : > { %v904_v4 = vmul.f32 128.0, %v3241_v3  ;;  %vm908_vm0 = vweird.f32 %v3241_v3 }
  0x8b   : > { %901 = vadd.xlane.f32.xlu0 %v896_v1 }
  0x8c   : > { %v905_v5 = vsub.f32 1.0, %v904_v4 }
  0x8e   : > { %v906_v6 = vmul.f32 %v3241_v3, %v905_v5 }
  0x90   : > { %v907_v7 = vadd.f32 %v3241_v3, %v906_v6 }
  0x92   : > { %v909_v8 = vsel %vm908_vm0, %v3241_v3, %v907_v7 }
  0xf6   : > { %v900_v9 = vpop.xlane.xlu0 %899 }
  0xf7   : > { %v910_v10 = vmul.f32 %v909_v8, %v900_v9 }
  0xf9   : > { %v912_v11 = vsub.f32 %v895_v0, %v910_v10 }
  0xfb   : > { %v914_v12 = vmul.f32 %v912_v11, %v912_v11 }
  0xfd   : > { %916 = vadd.xlane.f32.xlu1 %v914_v12 }
  0xfe   : > { %v902_v13 = vpop.xlane.xlu0 %901 }
  0xff   : > { %v911_v14 = vmul.f32 %v909_v8, %v902_v13 }
 0x101   : > { %v913_v15 = vsub.f32 %v896_v1, %v911_v14 }
 0x103   : > { %v915_v16 = vmul.f32 %v913_v15, %v913_v15 }
 0x105   : > { %918 = vadd.xlane.f32.xlu1 %v915_v16 }
 0x170   : > { %v917_v17 = vpop.xlane.xlu1 %916 }
 0x171   : > { %v920_v18 = vmul.f32 %v917_v17, %v909_v8 }
 0x173   : > { %v922_v19 = vadd.f32 1e-12, %v920_v18 }
 0x175   : > { %3242 = vrsqrt.f32 %v922_v19  ;;  %vm930_vm2 = vweird.f32 %v922_v19 }
 0x178   : > { %v919_v20 = vpop.xlane.xlu1 %918 }
 0x179   : > { %v921_v21 = vmul.f32 %v919_v20, %v909_v8 }
 0x17b   : > { %v3243_v22 = vpop.eup %3242  ;;  %v923_v23 = vadd.f32 1e-12, %v921_v21 }
 0x17c   : > { %v925_v24 = vmul.f32 %v3243_v22, %v922_v19  ;;  %vm931_vm1 = vweird.f32 %v3243_v22 }
 0x17d   : > { %3244 = vrsqrt.f32 %v923_v23  ;;  %vm932_vm3 = vmor %vm930_vm2, %vm931_vm1  ;;  %vm940_vm5 = vweird.f32 %v923_v23 }
 0x17e   : > { %v926_v25 = vmul.f32 %v3243_v22, %v925_v24 }
 0x180   : > { %v927_v26 = vmul.f32 0.5, %v926_v25 }
 0x182   : > { %v928_v27 = vsub.f32 1.5, %v927_v26 }
 0x183   : > { %v3245_v28 = vpop.eup %3244 }
 0x184   : > { %v929_v29 = vmul.f32 %v3243_v22, %v928_v27  ;;  %v935_v30 = vmul.f32 %v3245_v28, %v923_v23  ;;  %vm941_vm4 = vweird.f32 %v3245_v28 }
 0x185   : > { %vm942_vm6 = vmor %vm940_vm5, %vm941_vm4 }
 0x186   : > { %v933_v32 = vsel %vm932_vm3, %v3243_v22, %v929_v29  ;;  %v936_v33 = vmul.f32 %v3245_v28, %v935_v30 }
 0x187   : > { %v944_v35 = vmul.f32 %v933_v32, %v912_v11 }
 0x188   : > { %v937_v36 = vmul.f32 0.5, %v936_v33 }
 0x189   : > { %v949_v37 = vmul.f32 %v3238_v31, %v944_v35 }
 0x18a   : > { %v938_v38 = vsub.f32 1.5, %v937_v36 }
 0x18b   : > { %v954_v39 = vadd.f32 %v3239_v34, %v949_v37 }
 0x18c   : > { %v939_v40 = vmul.f32 %v3245_v28, %v938_v38 }
 0x18d   : > { %956 = vst [vmem:[#allocation2] sm:$0xff] %v954_v39 }
 0x18e   : > { %v943_v41 = vsel %vm942_vm6, %v3245_v28, %v939_v40 }
 0x18f   : > { %v945_v42 = vmul.f32 %v943_v41, %v913_v15 }
 0x191   : > { %v950_v43 = vmul.f32 %v3238_v31, %v945_v42 }
 0x193   : > { %v955_v44 = vadd.f32 %v3239_v34, %v950_v43 }
 0x195   : > { %957 = vst [vmem:[#allocation2 + $0x8] sm:$0xff] %v955_v44 }
 0x196 PF: > { %v2808_v45 = vld [vmem:[%s3819_s11 + $0xa8] sm:$0xf]  ;;  %v3088_v46 = vld [vmem:[%s3819_s11 + $0xb0] sm:$0xf0]  ;;  %v3087_v47 = vld [vmem:[%s3819_s11 + $0xac] sm:$0xf]  ;;  %s4356_s14 = scalar_lea.vmem %s4283_s7, %s3840_s21 }
 0x197   : > { %v2809_v48 = vor.u32 %v3088_v46, %v2808_v45  ;;  %v2810_v49 = vld [vmem:[%s3819_s11 + $0xb4] sm:$0xf0]  ;;  %v2796_v50 = vld [vmem:[%s3819_s11 + $0x90] sm:$0xf]  ;;  %v3085_v51 = vld [vmem:[%s3819_s11 + $0x98] sm:$0xf0] }
 0x198   : > { %v2813_v52 = vor.u32 %v3087_v47, %v2810_v49  ;;  %v3084_v53 = vld [vmem:[%s3819_s11 + $0x94] sm:$0xf]  ;;  %v2798_v54 = vld [vmem:[%s3819_s11 + $0x9c] sm:$0xf0]  ;;  %v2797_v55 = vor.u32 %v3085_v51, %v2796_v50  ;;  %v2784_v57 = vld [vmem:[%s3819_s11 + $0x78] sm:$0xf] }
 0x199   : > { %1129 = vmatpush.bf16.msra.mxu0 %v2809_v48  ;;  %v2801_v56 = vor.u32 %v3084_v53, %v2798_v54  ;;  %v3082_v58 = vld [vmem:[%s3819_s11 + $0x80] sm:$0xf0]  ;;  %v3081_v59 = vld [vmem:[%s3819_s11 + $0x7c] sm:$0xf]  ;;  %v2786_v60 = vld [vmem:[%s3819_s11 + $0x84] sm:$0xf0] }
 0x19a   : > { %1143 = vmatpush.bf16.msra.mxu1 %v2813_v52  ;;  %v2785_v61 = vor.u32 %v3082_v58, %v2784_v57  ;;  %v2789_v62 = vor.u32 %v3081_v59, %v2786_v60  ;;  %v2772_v63 = vld [vmem:[%s3819_s11 + $0x60] sm:$0xf]  ;;  %v3079_v0 = vld [vmem:[%s3819_s11 + $0x68] sm:$0xf0]  ;;  %v3078_v1 = vld [vmem:[%s3819_s11 + $0x64] sm:$0xf] }
 0x19b   : > { %v2774_v2 = vld [vmem:[%s3819_s11 + $0x6c] sm:$0xf0]  ;;  %v2773_v3 = vor.u32 %v3079_v0, %v2772_v63  ;;  %v2760_v4 = vld [vmem:[%s3819_s11 + $0x48] sm:$0xf]  ;;  %v3089_v6 = vld [vmem:[%s3819_s11 + $0xb8] sm:$0xf0] }
 0x19c   : > { %v2816_v5 = vld [vmem:[%s3819_s11 + $0xb0] sm:$0xf]  ;;  %v2777_v7 = vor.u32 %v3078_v1, %v2774_v2  ;;  %v3076_v8 = vld [vmem:[%s3819_s11 + $0x50] sm:$0xf0]  ;;  %v2804_v10 = vld [vmem:[%s3819_s11 + $0x98] sm:$0xf] }
 0x19d   : > { %1130 = vmatpush.bf16.msra.mxu0 %v2797_v55  ;;  %v2817_v9 = vor.u32 %v3089_v6, %v2816_v5  ;;  %v3086_v11 = vld [vmem:[%s3819_s11 + $0xa0] sm:$0xf0]  ;;  %v3075_v12 = vld [vmem:[%s3819_s11 + $0x4c] sm:$0xf]  ;;  %v2762_v13 = vld [vmem:[%s3819_s11 + $0x54] sm:$0xf0]  ;;  %v2761_v15 = vor.u32 %v3076_v8, %v2760_v4 }
 0x19e   : > { %1144 = vmatpush.bf16.msra.mxu1 %v2801_v56  ;;  %v2805_v14 = vor.u32 %v3086_v11, %v2804_v10  ;;  %v2748_v16 = vld [vmem:[%s3819_s11 + $0x30] sm:$0xf]  ;;  %v2792_v17 = vld [vmem:[%s3819_s11 + $0x80] sm:$0xf]  ;;  %v3083_v18 = vld [vmem:[%s3819_s11 + $0x88] sm:$0xf0]  ;;  %v2765_v19 = vor.u32 %v3075_v12, %v2762_v13 }
 0x19f   : > { %1157 = vmatpush.bf16.msra.mxu2 %v2817_v9  ;;  %v3073_v20 = vld [vmem:[%s3819_s11 + $0x38] sm:$0xf0]  ;;  %v3072_v21 = vld [vmem:[%s3819_s11 + $0x34] sm:$0xf]  ;;  %v2750_v22 = vld [vmem:[%s3819_s11 + $0x3c] sm:$0xf0]  ;;  %v2793_v25 = vor.u32 %v3083_v18, %v2792_v17 }
 0x1a0   : > { %v2780_v23 = vld [vmem:[%s3819_s11 + $0x68] sm:$0xf]  ;;  %v3080_v24 = vld [vmem:[%s3819_s11 + $0x70] sm:$0xf0]  ;;  %v2749_v26 = vor.u32 %v3073_v20, %v2748_v16  ;;  %v2753_v27 = vor.u32 %v3072_v21, %v2750_v22  ;;  %v2736_v28 = vld [vmem:[%s3819_s11 + $0x18] sm:$0xf] }
 0x1a1   : > { %1131 = vmatpush.bf16.msra.mxu0 %v2785_v61  ;;  %v3070_v29 = vld [vmem:[%s3819_s11 + $0x20] sm:$0xf0]  ;;  %v3069_v30 = vld [vmem:[%s3819_s11 + $0x1c] sm:$0xf]  ;;  %v2738_v31 = vld [vmem:[%s3819_s11 + $0x24] sm:$0xf0]  ;;  %v2781_v32 = vor.u32 %v3080_v24, %v2780_v23 }
 0x1a2   : > { %1145 = vmatpush.bf16.msra.mxu1 %v2789_v62  ;;  %v2737_v33 = vor.u32 %v3070_v29, %v2736_v28  ;;  %v2768_v34 = vld [vmem:[%s3819_s11 + $0x50] sm:$0xf]  ;;  %v3077_v35 = vld [vmem:[%s3819_s11 + $0x58] sm:$0xf0]  ;;  %v2741_v36 = vor.u32 %v3069_v30, %v2738_v31  ;;  %v2724_v37 = vld [vmem:[%s3819_s11] sm:$0xf] }
 0x1a3   : > { %1158 = vmatpush.bf16.msra.mxu2 %v2805_v14  ;;  %v3067_v38 = vld [vmem:[%s3819_s11 + $0x8] sm:$0xf0]  ;;  %v3066_v39 = vld [vmem:[%s3819_s11 + $0x4] sm:$0xf]  ;;  %v2726_v40 = vld [vmem:[%s3819_s11 + $0xc] sm:$0xf0]  ;;  %v2769_v42 = vor.u32 %v3077_v35, %v2768_v34 }
 0x1a4   : > { %v3940_v41 = vld [vmem:[#allocation2] sm:$0xff]  ;;  %v2725_v43 = vor.u32 %v3067_v38, %v2724_v37  ;;  %v3942_v44 = vld [vmem:[#allocation2 + $0x8] sm:$0xff]  ;;  %v3074_v46 = vld [vmem:[%s3819_s11 + $0x40] sm:$0xf0]  ;;  %v2729_v47 = vor.u32 %v3066_v39, %v2726_v40  ;;  %vm1179_vm7 = vcmask 261120   ;;  %s3560_s25 = smov 32  }
 0x1a5   : > { %1132 = vmatpush.bf16.msra.mxu0 %v2773_v3  ;;  %v2756_v45 = vld [vmem:[%s3819_s11 + $0x38] sm:$0xf]  ;;  %v960_v48 = vpack.c.bf16 %v3942_v44, %v3940_v41  ;;  %v2744_v50 = vld [vmem:[%s3819_s11 + $0x20] sm:$0xf]  ;;  %v3071_v51 = vld [vmem:[%s3819_s11 + $0x28] sm:$0xf0] }
 0x1a6   : > { %1146 = vmatpush.bf16.msra.mxu1 %v2777_v7  ;;  %v2757_v49 = vor.u32 %v3074_v46, %v2756_v45  ;;  %v2745_v52 = vor.u32 %v3071_v51, %v2744_v50  ;;  %v2732_v53 = vld [vmem:[%s3819_s11 + $0x8] sm:$0xf]  ;;  %v3068_v54 = vld [vmem:[%s3819_s11 + $0x10] sm:$0xf0]  ;;  %v3953_v56 = vld [vmem:[%s3856_s18] sm:$0x7] }
 0x1a7   : > { %1159 = vmatpush.bf16.msra.mxu2 %v2793_v25  ;;  %v2733_v55 = vor.u32 %v3068_v54, %v2732_v53  ;;  %v995_v57 = vperm.slane %v3953_v56, 0  ;;  %v996_v58 = vperm.slane %v3953_v56, 1  ;;  %s3558_s11 = smov 64   ;;  %s3559_s18 = smov 96   ;;  %vm1231_vm8 = vcmask 1043456  }
 0x1a8   : > { %s4354_s1 = sld [smem:[#allocation21_spill]]  ;;  %vm1202_vm9 = vcmask 64512   ;;  %p2994_p1 = scmp.ne.s32.totalorder %s3687_s2, 1 }
 0x1a9   : > { %1133 = vmatpush.bf16.msra.mxu0 %v2761_v15  ;;  %v997_v15 = vperm.slane %v3953_v56, 2  ;;  %s4357_s26 = sld [smem:[#allocation27_spill]] }
 0x1aa   : > { %1147 = vmatpush.bf16.msra.mxu1 %v2765_v19  ;;  %s4364_s9 = sld [smem:[#allocation38_spill]] (!%p2994_p1) }
 0x1ab   : > { %1160 = vmatpush.bf16.msra.mxu2 %v2781_v32 }
 0x1ad   : > { %1134 = vmatpush.bf16.msra.mxu0 %v2749_v26 }
 0x1ae   : > { %1148 = vmatpush.bf16.msra.mxu1 %v2753_v27  ;;  %s4355_s8 = smov %s4354_s1  ;;  %v3985_v29 = vld [vmem:[%s4354_s1] ss:$0 sm:$0xff] }
 0x1af   : > { %1161 = vmatpush.bf16.msra.mxu2 %v2769_v42  ;;  %s4358_s13 = scalar_lea.vmem %s4357_s26, %s3840_s21 }
 0x1b1   : > { %1135 = vmatpush.bf16.msra.mxu0 %v2737_v33 }
 0x1b2   : > { %1149 = vmatpush.bf16.msra.mxu1 %v2741_v36 }
 0x1b3   : > { %1162 = vmatpush.bf16.msra.mxu2 %v2757_v49 }
 0x1b5   : > { %1136 = vmatpush.bf16.msra.mxu0 %v2725_v43 }
 0x1b6   : > { %1150 = vmatpush.bf16.msra.mxu1 %v2729_v47  ;;  %v3997_v47 = vld [vmem:[%s4355_s8 + $0x1] ss:$0 sm:$0xff] }
 0x1b7   : > { %1163 = vmatpush.bf16.msra.mxu2 %v2745_v52 }
 0x1b8   : > { %1137 = vmatmul.bf16.vlgmr.msra.gmra.mxu0 %v960_v48 }
 0x1b9   : > { %1151 = vmatmul.bf16.vlgmr.msra.gmra.mxu1 %v960_v48 }
 0x1bb   : > { %1164 = vmatpush.bf16.msra.mxu2 %v2733_v55 }
 0x1be   : > { %1165 = vmatmul.bf16.vlgmr.msra.gmra.mxu2 %v960_v48 }
 0x235   : > { %v1138_v59 = vpop.f32.mrf.mxu0 }
 0x236   : > { %v1139_v60 = vadd.f32 %v1138_v59, %v995_v57  ;;  %v1152_v61 = vpop.f32.mrf.mxu1 }
 0x237   : > { %v1153_v62 = vadd.f32 %v1152_v61, %v996_v58 }
 0x239   : > { %v1171_v63 = vpack.c.bf16 %v1153_v62, %v1139_v60 }
 0x23b   : > { %v1177_v0 = vunpack.c.h.b16 %v1171_v63  ;;  %v1248_v8 = vunpack.c.l.b16 %v1171_v63 }
 0x23d   : > { %v1140_v1 = vpop.f32.mrf.mxu0  ;;  %v1178_v2 = vpack.c.b16 %v1177_v0, %v1177_v0  ;;  %v1249_v11 = vpack.c.b16 %v1248_v8, %v1248_v8 }
 0x23e   : > { %v1141_v3 = vadd.f32 %v1140_v1, %v995_v57  ;;  %v1154_v4 = vpop.f32.mrf.mxu1 }
 0x23f   : > { %v1155_v5 = vadd.f32 %v1154_v4, %v996_v58  ;;  %1326 = vrot.lane.b32.xlu2 %v1178_v2, %s3558_s11  ;;  %1252 = vrot.lane.b32.xlu1 %v1178_v2, %s3559_s18  ;;  %v1184_v6 = vsel %vm1179_vm7, %v1178_v2, 0 }
 0x240   : > { %1193 = vmatpush.bf16.xpose.msra.mxu3 %v1184_v6 }
 0x241   : > { %v1173_v7 = vpack.c.bf16 %v1155_v5, %v1141_v3  ;;  %v1166_v16 = vpop.f32.mrf.mxu2 }
 0x242   : > { %v1167_v17 = vadd.f32 %v1166_v16, %v997_v15 }
 0x243   : > { %v1485_v9 = vunpack.c.h.b16 %v1173_v7  ;;  %v1553_v13 = vunpack.c.l.b16 %v1173_v7 }
 0x244   : > { %v3974_v18 = vpack.c.bf16 %v1167_v17, %v1167_v17 }
 0x245   : > { %v1486_v10 = vpack.c.b16 %v1485_v9, %v1485_v9  ;;  %v1554_v14 = vpack.c.b16 %v1553_v13, %v1553_v13 }
 0x246   : > { %v1233_v19 = vsel %vm1231_vm8, %v3974_v18, 0 }
 0x247   : > { %1397 = vrot.lane.b32.xlu2 %v1178_v2, %s3560_s25  ;;  %1250 = vrot.lane.b32.xlu1 %v1249_v11, %s3559_s18  ;;  %v1491_v12 = vsel %vm1179_vm7, %v1486_v10, 0 }
 0x248   : > { %2818 = vmatmul.msk.bf16.vlgmr.msra.gmra.mxu3 %vm1179_vm7, %v1171_v63  ;;  %1500 = vmatpush.bf16.xpose.msrb.mxu1 %v1491_v12 }
 0x249   : > { %1242 = vmatpush.bf16.msrb.mxu3 %v1233_v19  ;;  %v4013_v9 = vpop.f32.mrf.mxu2 }
 0x24f   : > { %2826 = vmatmul.msk.bf16.vlgmr.msrb.gmra.mxu1 %vm1179_vm7, %v1173_v7  ;;  %1557 = vrot.lane.b32.xlu2 %v1486_v10, %s3559_s18 }
 0x250   : > { %1395 = vrot.lane.b32.xlu1 %v1249_v11, %s3560_s25 }
 0x257   : > { %1631 = vrot.lane.b32.xlu2 %v1486_v10, %s3558_s11 }
 0x258   : > { %1555 = vrot.lane.b32.xlu1 %v1554_v14, %s3559_s18 }
 0x25f   : > { %1629 = vrot.lane.b32.xlu2 %v1554_v14, %s3558_s11 }
 0x260   : > { %1702 = vrot.lane.b32.xlu1 %v1486_v10, %s3560_s25 }
 0x299   : > { %v1327_v20 = vpop.permute.xlu2 %1326 }
 0x29a   : > { %v1332_v21 = vsel %vm1179_vm7, %v1327_v20, 0 }
 0x29b   : > { %1341 = vmatpush.bf16.xpose.msrb.mxu2 %v1332_v21 }
 0x2a1   : > { %v1398_v22 = vpop.permute.xlu2 %1397 }
 0x2a2   : > { %v1403_v2 = vsel %vm1179_vm7, %v1398_v22, 0 }
 0x2a9   : > { %v1558_v23 = vpop.permute.xlu2 %1557 }
 0x2aa   : > { %v1563_v4 = vsel %vm1179_vm7, %v1558_v23, 0 }
 0x2b1   : > { %v1632_v24 = vpop.permute.xlu2 %1631  ;;  %v1253_v25 = vpop.permute.xlu1 %1252 }
 0x2b2   : > { %v1637_v26 = vsel %vm1179_vm7, %v1632_v24, 0  ;;  %v1258_v27 = vsel %vm1179_vm7, %v1253_v25, 0 }
 0x2b3   : > { %1267 = vmatpush.bf16.xpose.msra.mxu3 %v1258_v27  ;;  %1646 = vmatpush.bf16.xpose.msra.mxu1 %v1637_v26 }
 0x2b9   : > { %v1630_v28 = vpop.permute.xlu2 %1629  ;;  %v1251_v1 = vpop.permute.xlu1 %1250 }
 0x2ba   : > { %2830 = vmatmul.msk.bf16.vlgmr.msra.gmra.mxu1 %vm1179_vm7, %v1630_v28 }
 0x2c2   : > { %v1396_v3 = vpop.permute.xlu1 %1395 }
 0x2ca   : > { %v1556_v5 = vpop.permute.xlu1 %1555 }
 0x2cb   : > { %v1195_v30 = vpop.f32.mrf.mxu3 }
 0x2cc   : > { %v1199_v31 = vmul.f32 0.17677669, %v1195_v30  ;;  %v3987_v32 = vpop.f32.mrf.mxu1 }
 0x2ce   : > { %v1201_v33 = vadd.f32 %v3985_v29, %v1199_v31 }
 0x2d0   : > { %v1203_v34 = vsel %vm1202_vm9, %v1201_v33, -inf }
 0x2d1   : > { %1204 = vmax.xlane.f32.xlu0 %v1203_v34 }
 0x2d2   : > { %v1703_v6 = vpop.permute.xlu1 %1702 }
 0x2d3   : > { %v1197_v35 = vpop.f32.mrf.mxu3  ;;  %v1708_v7 = vsel %vm1179_vm7, %v1703_v6, 0 }
 0x2d4   : > { %v1504_v36 = vpop.f32.mrf.mxu1 }
 0x337   : > { %v1648_v37 = vpop.f32.mrf.mxu1 }
 0x338   : > { %v1652_v46 = vmul.f32 0.17677669, %v1648_v37 }
 0x33a   : > { %v4000_v48 = vadd.f32 %v3997_v47, %v1652_v46 }
 0x33c   : > { %v1654_v49 = vsel %vm1202_vm9, %v4000_v48, -inf }
 0x33f   : > { %v1650_v38 = vpop.f32.mrf.mxu1 }
 0x344   : > { %v1205_v39 = vpop.xlane.xlu0 %1204 }
 0x345   : > { %v1206_v40 = vsub.f32 %v1201_v33, %v1205_v39 }
 0x347   : > { %v1207_v42 = vmul.f32 1.442695, %v1206_v40 }
 0x349   : > { %3269 = vpow2.f32 %v1207_v42 }
 0x34f   : > { %v3270_v43 = vpop.eup %3269 }
 0x350   : > { %v1209_v45 = vsel %vm1202_vm9, %v3270_v43, 0.0 }
 0x351   : > { %1210 = vadd.xlane.f32.xlu0 %v1209_v45 }
 0x365   : > { %1324 = vrot.lane.b32.xlu0 %v1249_v11, %s3558_s11 }
 0x36d   : > { %1700 = vrot.lane.b32.xlu0 %v1554_v14, %s3560_s25  ;;  %v1506_v14 = vmul.f32 0.17677669, %v3987_v32 }
 0x36f   : > { %v1508_v19 = vadd.f32 %v3997_v47, %v1506_v14 }
 0x371   : > { %v1509_v21 = vsel %vm1202_vm9, %v1508_v19, -inf }
 0x397   : > { %1655 = vmax.xlane.f32.xlu0 %v1654_v49 }
 0x3c4   : > { %v1211_v50 = vpop.xlane.xlu0 %1210 }
 0x3c5   : > { %3271 = vrcp.f32 %v1211_v50  ;;  %v1223_v54 = vand.u32 2147483648, %v1211_v50  ;;  %v1221_v57 = vand.u32 2147483647, %v1211_v50  ;;  %vm1217_vm11 = vweird.f32 %v1211_v50 }
 0x3c7   : > { %v1224_v59 = vor.u32 1.1754944e-38, %v1223_v54  ;;  %vm1222_vm13 = vcmp.eq.f32.partialorder %v1221_v57, 8.507059e+37 }
 0x3cb   : > { %v3272_v51 = vpop.eup %3271 }
 0x3cc   : > { %v1213_v52 = vmul.f32 %v3272_v51, %v1211_v50  ;;  %vm1218_vm10 = vweird.f32 %v3272_v51 }
 0x3cd   : > { %vm1219_vm12 = vmor %vm1217_vm11, %vm1218_vm10 }
 0x3ce   : > { %v1214_v53 = vsub.f32 1.0, %v1213_v52 }
 0x3d0   : > { %v1215_v55 = vmul.f32 %v3272_v51, %v1214_v53 }
 0x3d2   : > { %v1216_v58 = vadd.f32 %v3272_v51, %v1215_v55 }
 0x3d4   : > { %v1220_v60 = vsel %vm1219_vm12, %v3272_v51, %v1216_v58 }
 0x3d5   : > { %v1225_v61 = vsel %vm1222_vm13, %v1224_v59, %v1220_v60 }
 0x3d6   : > { %v1226_v62 = vmul.f32 %v3270_v43, %v1225_v61 }
 0x3d7   : > { %v1325_v63 = vpop.permute.xlu0 %1324 }
 0x3d8   : > { %2822 = vmatmul.msk.bf16.vlgmr.msrb.gmra.mxu2 %vm1179_vm7, %v1325_v63  ;;  %v1227_v0 = vpack.c.bf16 %v1226_v62, %v1226_v62 }
 0x3da   : > { %2819 = vmatmul.msk.bf16.vlgmr.msrb.gmra.mxu3 %vm1202_vm9, %v1227_v0 }
 0x3db   : > { %1412 = vmatpush.bf16.xpose.msrb.mxu3 %v1403_v2 }
 0x3df   : > { %v1701_v8 = vpop.permute.xlu0 %1700 }
 0x3ea   : > { %2820 = vmatmul.msk.bf16.vlgmr.msra.gmra.mxu3 %vm1179_vm7, %v1251_v1 }
 0x3eb   : > { %1572 = vmatpush.bf16.xpose.msra.mxu3 %v1563_v4 }
 0x3fa   : > { %2824 = vmatmul.msk.bf16.vlgmr.msrb.gmra.mxu3 %vm1179_vm7, %v1396_v3 }
 0x3fb   : > { %1717 = vmatpush.bf16.xpose.msrb.mxu3 %v1708_v7  ;;  %v1169_v7 = vadd.f32 %v4013_v9, %v997_v15 }
 0x40a   : > { %2828 = vmatmul.msk.bf16.vlgmr.msra.gmra.mxu3 %vm1179_vm7, %v1556_v5  ;;  %v1656_v1 = vpop.xlane.xlu0 %1655 }
 0x40b   : > { %v1657_v3 = vsub.f32 %v4000_v48, %v1656_v1  ;;  %v4057_v48 = vpack.c.bf16 %v1169_v7, %v1169_v7 }
 0x40d   : > { %v1658_v4 = vmul.f32 1.442695, %v1657_v3 }
 0x41a   : > { %2832 = vmatmul.msk.bf16.vlgmr.msrb.gmra.mxu3 %vm1179_vm7, %v1701_v8 }
 0x45b   : > { %v1343_v10 = vpop.f32.mrf.mxu2 }
 0x45c   : > { %v1347_v11 = vmul.f32 0.17677669, %v1343_v10  ;;  %v1606_v10 = vunpack.c.l.b16 %v4057_v48 }
 0x45d   : > { %v4015_v12 = vpop.f32.mrf.mxu3 }
 0x45e   : > { %v1348_v13 = vadd.f32 %v3985_v29, %v1347_v11  ;;  %v1607_v11 = vpack.c.b16 %v1606_v10, %v1606_v10 }
 0x460   : > { %v1349_v16 = vsel %vm1202_vm9, %v1348_v13, -inf }
 0x461   : > { %1350 = vmax.xlane.f32.xlu2 %v1349_v16 }
 0x463   : > { %v1345_v17 = vpop.f32.mrf.mxu2 }
 0x465   : > { %v1246_v20 = vpop.f32.mrf.mxu3 }
 0x469   : > { %1510 = vmax.xlane.f32.xlu2 %v1509_v21 }
 0x46d   : > { %v1269_v22 = vpop.f32.mrf.mxu3 }
 0x46e   : > { %v1273_v23 = vmul.f32 0.17677669, %v1269_v22 }
 0x470   : > { %v1274_v24 = vadd.f32 %v3985_v29, %v1273_v23 }
 0x472   : > { %v1275_v25 = vsel %vm1202_vm9, %v1274_v24, -inf }
 0x473   : > { %1276 = vmax.xlane.f32.xlu1 %v1275_v25 }
 0x475   : > { %v1271_v26 = vpop.f32.mrf.mxu3 }
 0x47d   : > { %v1414_v27 = vpop.f32.mrf.mxu3 }
 0x47e   : > { %v1418_v50 = vmul.f32 0.17677669, %v1414_v27 }
 0x480   : > { %v1419_v52 = vadd.f32 %v3985_v29, %v1418_v50  ;;  %v1301_v29 = vunpack.c.l.b16 %v3974_v18 }
 0x482   : > { %v1420_v55 = vsel %vm1202_vm9, %v1419_v52, -inf  ;;  %v1302_v62 = vpack.c.b16 %v1301_v29, %v1301_v29 }
 0x485   : > { %v1416_v28 = vpop.f32.mrf.mxu3 }
 0x48d   : > { %v1574_v30 = vpop.f32.mrf.mxu3 }
 0x48e   : > { %v1578_v31 = vmul.f32 0.17677669, %v1574_v30 }
 0x490   : > { %v1579_v32 = vadd.f32 %v3997_v47, %v1578_v31 }
 0x492   : > { %v1580_v33 = vsel %vm1202_vm9, %v1579_v32, -inf }
 0x493   : > { %1581 = vmax.xlane.f32.xlu1 %v1580_v33 }
 0x495   : > { %v1576_v34 = vpop.f32.mrf.mxu3 }
 0x49d   : > { %v1719_v35 = vpop.f32.mrf.mxu3 }
 0x49e   : > { %v1723_v36 = vmul.f32 0.17677669, %v1719_v35 }
 0x4a0   : > { %v4027_v37 = vadd.f32 %v3997_v47, %v1723_v36 }
 0x4a2   : > { %v1725_v38 = vsel %vm1202_vm9, %v4027_v37, -inf }
 0x4a3   : > { %1726 = vmax.xlane.f32.xlu2 %v1725_v38 }
 0x4a5   : > { %v1721_v39 = vpop.f32.mrf.mxu3 }
 0x4d4   : > { %v1351_v40 = vpop.xlane.xlu2 %1350 }
 0x4d5   : > { %v1352_v42 = vsub.f32 %v1348_v13, %v1351_v40 }
 0x4d7   : > { %v1353_v43 = vmul.f32 1.442695, %v1352_v42 }
 0x4d9   : > { %3273 = vpow2.f32 %v1353_v43 }
 0x4dc   : > { %v1511_v45 = vpop.xlane.xlu2 %1510 }
 0x4dd   : > { %v1512_v49 = vsub.f32 %v1508_v19, %v1511_v45 }
 0x4df   : > { %v4031_v46 = vpop.eup %3273  ;;  %v1513_v47 = vmul.f32 1.442695, %v1512_v49 }
 0x4e0   : > { %v1355_v51 = vsel %vm1202_vm9, %v4031_v46, 0.0 }
 0x4e1   : > { %1356 = vadd.xlane.f32.xlu0 %v1355_v51  ;;  %3275 = vpow2.f32 %v1513_v47 }
 0x4e6   : > { %v1277_v53 = vpop.xlane.xlu1 %1276 }
 0x4e7   : > { %v1278_v54 = vsub.f32 %v1274_v24, %v1277_v53  ;;  %v4037_v58 = vpop.eup %3275 }
 0x4e8   : > { %v1515_v59 = vsel %vm1202_vm9, %v4037_v58, 0.0 }
 0x4e9   : > { %v1279_v57 = vmul.f32 1.442695, %v1278_v54  ;;  %1421 = vmax.xlane.f32.xlu0 %v1420_v55 }
 0x4eb   : > { %3277 = vpow2.f32 %v1279_v57 }
 0x4f1   : > { %v3278_v60 = vpop.eup %3277  ;;  %1516 = vadd.xlane.f32.xlu0 %v1515_v59 }
 0x4f2   : > { %v1281_v61 = vsel %vm1202_vm9, %v3278_v60, 0.0 }
 0x4f3   : > { %1282 = vadd.xlane.f32.xlu1 %v1281_v61 }
 0x505   : > { %1445 = vrot.lane.b32.xlu0 %v1302_v62, %s3560_s25 }
 0x506   : > { %v1582_v63 = vpop.xlane.xlu1 %1581 }
 0x507   : > { %v1583_v0 = vsub.f32 %v1579_v32, %v1582_v63 }
 0x509   : > { %v1584_v2 = vmul.f32 1.442695, %v1583_v0 }
 0x50b   : > { %3279 = vpow2.f32 %v1584_v2 }
 0x50c   : > { %1303 = vrot.lane.b32.xlu1 %v1302_v62, %s3559_s18  ;;  %3281 = vpow2.f32 %v1658_v4 }
 0x511   : > { %v4046_v5 = vpop.eup %3279 }
 0x512   : > { %v1586_v6 = vsel %vm1202_vm9, %v4046_v5, 0.0  ;;  %v4050_v18 = vpop.eup %3281 }
 0x513   : > { %v1660_v8 = vsel %vm1202_vm9, %v4050_v18, 0.0 }
 0x516   : > { %v1727_v38 = vpop.xlane.xlu2 %1726 }
 0x517   : > { %v1728_v39 = vsub.f32 %v4027_v37, %v1727_v38 }
 0x519   : > { %v1729_v40 = vmul.f32 1.442695, %v1728_v39 }
 0x52f   : > { %1587 = vadd.xlane.f32.xlu0 %v1586_v6 }
 0x536   : > { %1661 = vadd.xlane.f32.xlu1 %v1660_v8 }
 0x543   : > { %1608 = vrot.lane.b32.xlu0 %v1607_v11, %s3559_s18 }
 0x54b   : > { %1679 = vrot.lane.b32.xlu0 %v1607_v11, %s3558_s11 }
 0x553   : > { %1750 = vrot.lane.b32.xlu0 %v1607_v11, %s3560_s25  ;;  %v1538_v11 = vsel %vm1231_vm8, %v4057_v48, 0 }
 0x554   : > { %v4063_v13 = vpop.xlane.xlu0 %1356 }
 0x555   : > { %v1369_v55 = vand.u32 2147483648, %v4063_v13  ;;  %vm1363_vm3 = vweird.f32 %v4063_v13  ;;  %v1367_v57 = vand.u32 2147483647, %v4063_v13 }
 0x557   : > { %v1370_v29 = vor.u32 1.1754944e-38, %v1369_v55  ;;  %vm1368_vm5 = vcmp.eq.f32.partialorder %v1367_v57, 8.507059e+37 }
 0x55c   : > { %v1422_v56 = vpop.xlane.xlu0 %1421 }
 0x55d   : > { %v1423_v14 = vsub.f32 %v1419_v52, %v1422_v56 }
 0x55f   : > { %v1424_v15 = vmul.f32 1.442695, %v1423_v14 }
 0x561   : > { %3283 = vpow2.f32 %v1424_v15 }
 0x564   : > { %v4069_v25 = vpop.xlane.xlu0 %1516 }
 0x565   : > { %v1529_v48 = vand.u32 2147483648, %v4069_v25  ;;  %vm1523_vm12 = vweird.f32 %v4069_v25 }
 0x566   : > { %v1283_v9 = vpop.xlane.xlu1 %1282 }
 0x567   : > { %v4065_v16 = vpop.eup %3283  ;;  %3285 = vrcp.f32 %v1283_v9  ;;  %v1295_v24 = vand.u32 2147483648, %v1283_v9  ;;  %vm1289_vm15 = vweird.f32 %v1283_v9  ;;  %v1293_v26 = vand.u32 2147483647, %v1283_v9 }
 0x568   : > { %v1426_v17 = vsel %vm1202_vm9, %v4065_v16, 0.0  ;;  %3287 = vpow2.f32 %v1729_v40 }
 0x569   : > { %1427 = vadd.xlane.f32.xlu2 %v1426_v17  ;;  %v1296_v28 = vor.u32 1.1754944e-38, %v1295_v24  ;;  %vm1294_vm1 = vcmp.eq.f32.partialorder %v1293_v26, 8.507059e+37  ;;  %3289 = vrcp.f32 %v4063_v13 }
 0x56a   : > { %3291 = vrcp.f32 %v4069_v25 }
 0x56d   : > { %v3286_v19 = vpop.eup %3285 }
 0x56e   : > { %v1285_v20 = vmul.f32 %v3286_v19, %v1283_v9  ;;  %vm1290_vm14 = vweird.f32 %v3286_v19  ;;  %v4076_v42 = vpop.eup %3287 }
 0x56f   : > { %vm1291_vm0 = vmor %vm1289_vm15, %vm1290_vm14  ;;  %v1731_v43 = vsel %vm1202_vm9, %v4076_v42, 0.0  ;;  %v3290_v51 = vpop.eup %3289 }
 0x570   : > { %v1286_v21 = vsub.f32 1.0, %v1285_v20  ;;  %v1359_v47 = vmul.f32 %v3290_v51, %v4063_v13  ;;  %vm1364_vm2 = vweird.f32 %v3290_v51  ;;  %v3292_v54 = vpop.eup %3291 }
 0x571   : > { %vm1365_vm4 = vmor %vm1363_vm3, %vm1364_vm2  ;;  %v1519_v61 = vmul.f32 %v3292_v54, %v4069_v25  ;;  %vm1524_vm10 = vweird.f32 %v3292_v54 }
 0x572   : > { %v1287_v22 = vmul.f32 %v3286_v19, %v1286_v21  ;;  %v1360_v37 = vsub.f32 1.0, %v1359_v47  ;;  %vm1525_vm14 = vmor %vm1523_vm12, %vm1524_vm10 }
 0x573   : > { %v1520_v63 = vsub.f32 1.0, %v1519_v61 }
 0x574   : > { %v1288_v23 = vadd.f32 %v3286_v19, %v1287_v22  ;;  %v1361_v52 = vmul.f32 %v3290_v51, %v1360_v37 }
 0x575   : > { %v1521_v7 = vmul.f32 %v3292_v54, %v1520_v63 }
 0x576   : > { %v1292_v27 = vsel %vm1291_vm0, %v3286_v19, %v1288_v23  ;;  %v1362_v53 = vadd.f32 %v3290_v51, %v1361_v52  ;;  %v1527_v23 = vand.u32 2147483647, %v4069_v25 }
 0x577   : > { %v1297_v30 = vsel %vm1294_vm1, %v1296_v28, %v1292_v27  ;;  %v1446_v31 = vpop.permute.xlu0 %1445  ;;  %v1522_v17 = vadd.f32 %v3292_v54, %v1521_v7 }
 0x578   : > { %v1298_v32 = vmul.f32 %v3278_v60, %v1297_v30  ;;  %v1451_v35 = vsel %vm1231_vm8, %v1446_v31, 0  ;;  %v1366_v60 = vsel %vm1365_vm4, %v3290_v51, %v1362_v53  ;;  %v1530_v31 = vor.u32 1.1754944e-38, %v1529_v48 }
 0x579   : > { %v1526_v27 = vsel %vm1525_vm14, %v3292_v54, %v1522_v17  ;;  %vm1528_vm0 = vcmp.eq.f32.partialorder %v1527_v23, 8.507059e+37 }
 0x57a   : > { %v1299_v36 = vpack.c.bf16 %v1298_v32, %v1298_v32 }
 0x57e   : > { %v1304_v33 = vpop.permute.xlu1 %1303 }
 0x57f   : > { %v1309_v34 = vsel %vm1231_vm8, %v1304_v33, 0 }
 0x580   : > { %1318 = vmatpush.bf16.msrb.mxu0 %v1309_v34 }
 0x581   : > { %1374 = vrot.lane.b32.xlu2 %v1302_v62, %s3558_s11  ;;  %v1371_v62 = vsel %vm1368_vm5, %v1370_v29, %v1366_v60 }
 0x582   : > { %v1372_v3 = vmul.f32 %v4031_v46, %v1371_v62 }
 0x583   : > { %2821 = vmatmul.msk.bf16.vlgmr.msrb.gmra.mxu0 %vm1202_vm9, %v1299_v36 }
 0x584   : > { %1460 = vmatpush.bf16.msra.mxu0 %v1451_v35  ;;  %v1373_v15 = vpack.c.bf16 %v1372_v3, %v1372_v3  ;;  %v1531_v35 = vsel %vm1528_vm0, %v1530_v31, %v1526_v27  ;;  %v3096_v27 = vld [vmem:[%s3847_s27 + $0x30] sm:$0xff]  ;;  %v3093_v31 = vld [vmem:[%s3847_s27 + $0x18] sm:$0xff] }
 0x585   : > { %v1532_v40 = vmul.f32 %v4037_v58, %v1531_v35 }
 0x587   : > { %v1533_v47 = vpack.c.bf16 %v1532_v40, %v1532_v40 }
 0x5a2   : > { %v4080_v45 = vpop.xlane.xlu0 %1587 }
 0x5a3   : > { %3293 = vrcp.f32 %v4080_v45  ;;  %vm1594_vm2 = vweird.f32 %v4080_v45 }
 0x5a9   : > { %v4091_v0 = vpop.xlane.xlu1 %1661  ;;  %v4093_v1 = vpop.eup %3293 }
 0x5aa   : > { %1732 = vadd.xlane.f32.xlu2 %v1731_v43  ;;  %v1590_v13 = vmul.f32 %v4093_v1, %v4080_v45  ;;  %vm1595_vm1 = vweird.f32 %v4093_v1  ;;  %v1600_v43 = vand.u32 2147483648, %v4080_v45  ;;  %v1674_v58 = vand.u32 2147483648, %v4091_v0 }
 0x5ab   : > { %vm1596_vm3 = vmor %vm1594_vm2, %vm1595_vm1  ;;  %vm1668_vm5 = vweird.f32 %v4091_v0  ;;  %v1672_v53 = vand.u32 2147483647, %v4091_v0 }
 0x5ac   : > { %v1591_v21 = vsub.f32 1.0, %v1590_v13  ;;  %v1601_v51 = vor.u32 1.1754944e-38, %v1600_v43  ;;  %v1675_v55 = vor.u32 1.1754944e-38, %v1674_v58 }
 0x5ad   : > { %vm1673_vm10 = vcmp.eq.f32.partialorder %v1672_v53, 8.507059e+37 }
 0x5ae   : > { %v1592_v32 = vmul.f32 %v4093_v1, %v1591_v21 }
 0x5b0   : > { %v1593_v25 = vadd.f32 %v4093_v1, %v1592_v32  ;;  %v3092_v32 = vld [vmem:[%s3847_s27 + $0x10] sm:$0xff] }
 0x5b5   : > { %v1609_v49 = vpop.permute.xlu0 %1608 }
 0x5b6   : > { %v1614_v50 = vsel %vm1231_vm8, %v1609_v49, 0 }
 0x5b7   : > { %1623 = vmatpush.bf16.msrb.mxu0 %v1614_v50  ;;  %v1597_v50 = vsel %vm1596_vm3, %v4093_v1, %v1593_v25 }
 0x5bd   : > { %v1680_v8 = vpop.permute.xlu0 %1679 }
 0x5be   : > { %v1685_v19 = vsel %vm1231_vm8, %v1680_v8, 0 }
 0x5c5   : > { %v1751_v34 = vpop.permute.xlu0 %1750 }
 0x5c6   : > { %v1756_v39 = vsel %vm1231_vm8, %v1751_v34, 0  ;;  %v3090_v34 = vld [vmem:[%s3847_s27] sm:$0xff] }
 0x5dc   : > { %v1428_v59 = vpop.xlane.xlu2 %1427 }
 0x5dd   : > { %3295 = vrcp.f32 %v1428_v59  ;;  %v1440_v14 = vand.u32 2147483648, %v1428_v59  ;;  %v1438_v9 = vand.u32 2147483647, %v1428_v59  ;;  %vm1434_vm11 = vweird.f32 %v1428_v59 }
 0x5de   : > { %3297 = vrcp.f32 %v4091_v0 }
 0x5df   : > { %v1441_v24 = vor.u32 1.1754944e-38, %v1440_v14  ;;  %vm1439_vm15 = vcmp.eq.f32.partialorder %v1438_v9, 8.507059e+37 }
 0x5e3   : > { %v3296_v2 = vpop.eup %3295 }
 0x5e4   : > { %v1430_v4 = vmul.f32 %v3296_v2, %v1428_v59  ;;  %v1375_v6 = vpop.permute.xlu2 %1374  ;;  %vm1435_vm6 = vweird.f32 %v3296_v2  ;;  %v3298_v20 = vpop.eup %3297 }
 0x5e5   : > { %v1380_v10 = vsel %vm1231_vm8, %v1375_v6, 0  ;;  %vm1436_vm13 = vmor %vm1434_vm11, %vm1435_vm6  ;;  %v1664_v28 = vmul.f32 %v3298_v20, %v4091_v0  ;;  %vm1669_vm8 = vweird.f32 %v3298_v20 }
 0x5e6   : > { %v1431_v56 = vsub.f32 1.0, %v1430_v4  ;;  %1389 = vmatpush.bf16.msra.mxu2 %v1380_v10  ;;  %vm1670_vm6 = vmor %vm1668_vm5, %vm1669_vm8 }
 0x5e7   : > { %v1665_v38 = vsub.f32 1.0, %v1664_v28  ;;  %v3095_v28 = vld [vmem:[%s3847_s27 + $0x28] sm:$0xff] }
 0x5e8   : > { %v1432_v46 = vmul.f32 %v3296_v2, %v1431_v56 }
 0x5e9   : > { %2823 = vmatmul.msk.bf16.vlgmr.msra.gmra.mxu2 %vm1202_vm9, %v1373_v15  ;;  %v1666_v49 = vmul.f32 %v3298_v20, %v1665_v38 }
 0x5ea   : > { %1547 = vmatpush.bf16.msrb.mxu2 %v1538_v11  ;;  %v1433_v22 = vadd.f32 %v3296_v2, %v1432_v46 }
 0x5eb   : > { %v1667_v52 = vadd.f32 %v3298_v20, %v1666_v49 }
 0x5ec   : > { %v1437_v26 = vsel %vm1436_vm13, %v3296_v2, %v1433_v22 }
 0x5ed   : > { %v1442_v30 = vsel %vm1439_vm15, %v1441_v24, %v1437_v26  ;;  %v1671_v54 = vsel %vm1670_vm6, %v3298_v20, %v1667_v52  ;;  %v3097_v26 = vld [vmem:[%s3847_s27 + $0x38] sm:$0xff]  ;;  %vm1481_vm15 = vcmask 785408  }
 0x5ee   : > { %1694 = vmatpush.bf16.msra.mxu2 %v1685_v19  ;;  %v1443_v33 = vmul.f32 %v4065_v16, %v1442_v30  ;;  %v1598_v16 = vand.u32 2147483647, %v4080_v45  ;;  %v1676_v57 = vsel %vm1673_vm10, %v1675_v55, %v1671_v54  ;;  %1855 = vmatpush.bf16.msrb.mxu1 %v3097_v26  ;;  %v3094_v30 = vld [vmem:[%s3847_s27 + $0x20] sm:$0xff]  ;;  %v2900_v26 = vld [vmem:[%s3826_s19 + $0x40] sm:$0xf] }
 0x5ef   : > { %v1677_v61 = vmul.f32 %v4050_v18, %v1676_v57 }
 0x5f0   : > { %v1444_v36 = vpack.c.bf16 %v1443_v33, %v1443_v33  ;;  %vm1599_vm4 = vcmp.eq.f32.partialorder %v1598_v16, 8.507059e+37  ;;  %v3091_v33 = vld [vmem:[%s3847_s27 + $0x8] sm:$0xff] }
 0x5f1   : > { %v1602_v37 = vsel %vm1599_vm4, %v1601_v51, %v1597_v50  ;;  %v1678_v29 = vpack.c.bf16 %v1677_v61, %v1677_v61  ;;  %v3561_v61 = vmov 128.0  }
 0x5f2   : > { %2825 = vmatmul.msk.bf16.vlgmr.msra.gmra.mxu0 %vm1202_vm9, %v1444_v36  ;;  %v1603_v45 = vmul.f32 %v4046_v5, %v1602_v37  ;;  %1856 = vmatpush.bf16.msrb.mxu1 %v3096_v27  ;;  %v3107_v27 = vld [vmem:[%s3826_s19 + $0x44] sm:$0xf0] }
 0x5f3   : > { %1765 = vmatpush.bf16.msra.mxu0 %v1756_v39 }
 0x5f4   : > { %v1604_v60 = vpack.c.bf16 %v1603_v45, %v1603_v45  ;;  %v3263_v45 = vld [vmem:[%s4356_s14] ss:$0 sm:$0xff] }
 0x5f6   : > { %1857 = vmatpush.bf16.msrb.mxu1 %v3095_v28  ;;  %v3106_v28 = vld [vmem:[%s3826_s19 + $0x44] sm:$0xf] }
 0x5f9   : > { %2827 = vmatmul.msk.bf16.vlgmr.msrb.gmra.mxu2 %vm1202_vm9, %v1533_v47 }
 0x5fa   : > { %1858 = vmatpush.bf16.msrb.mxu1 %v3094_v30  ;;  %v2901_v30 = vor.u32 %v3107_v27, %v2900_v26  ;;  %v3119_v26 = vld [vmem:[%s3832_s28 + $0x28] sm:$0xff] }
 0x5fb   : > { %v3127_v27 = vld [vmem:[%s3832_s28 + $0x68] sm:$0xff] }
 0x5fe   : > { %1859 = vmatpush.bf16.msrb.mxu1 %v3093_v31  ;;  %v2902_v31 = vld [vmem:[%s3826_s19 + $0x48] sm:$0xf0] }
 0x600   : > { %v1320_v59 = vpop.f32.mrf.mxu0 }
 0x602   : > { %2829 = vmatmul.msk.bf16.vlgmr.msrb.gmra.mxu0 %vm1202_vm9, %v1604_v60  ;;  %1860 = vmatpush.bf16.msrb.mxu1 %v3092_v32  ;;  %v2905_v32 = vor.u32 %v3106_v28, %v2902_v31  ;;  %v3118_v28 = vld [vmem:[%s3832_s28 + $0x20] sm:$0xff]  ;;  %v3117_v31 = vld [vmem:[%s3832_s28 + $0x18] sm:$0xff] }
 0x606   : > { %1861 = vmatpush.bf16.msrb.mxu1 %v3091_v33  ;;  %v2892_v33 = vld [vmem:[%s3826_s19 + $0x30] sm:$0xf] }
 0x608   : > { %v1322_v62 = vpop.f32.mrf.mxu0 }
 0x609   : > { %2831 = vmatmul.msk.bf16.vlgmr.msra.gmra.mxu2 %vm1202_vm9, %v1678_v29 }
 0x60a   : > { %1862 = vmatpush.bf16.msrb.mxu1 %v3090_v34  ;;  %v3105_v34 = vld [vmem:[%s3826_s19 + $0x34] sm:$0xf0] }
 0x61d   : > { %v1733_v63 = vpop.xlane.xlu2 %1732 }
 0x61e   : > { %3299 = vrcp.f32 %v1733_v63  ;;  %v1745_v2 = vand.u32 2147483648, %v1733_v63  ;;  %v1743_v4 = vand.u32 2147483647, %v1733_v63  ;;  %vm1739_vm12 = vweird.f32 %v1733_v63 }
 0x61f   : > { %3301 = vrcp.f32 %v3561_v61 }
 0x620   : > { %v1746_v7 = vor.u32 1.1754944e-38, %v1745_v2  ;;  %vm1744_vm14 = vcmp.eq.f32.partialorder %v1743_v4, 8.507059e+37 }
 0x624   : > { %v3300_v0 = vpop.eup %3299 }
 0x625   : > { %v1735_v1 = vmul.f32 %v3300_v0, %v1733_v63  ;;  %vm1740_vm11 = vweird.f32 %v3300_v0  ;;  %v3302_v29 = vpop.eup %3301 }
 0x626   : > { %vm1741_vm13 = vmor %vm1739_vm12, %vm1740_vm11  ;;  %v1878_v62 = vmul.f32 128.0, %v3302_v29 }
 0x627   : > { %v1736_v5 = vsub.f32 1.0, %v1735_v1 }
 0x628   : > { %v1879_v63 = vsub.f32 1.0, %v1878_v62 }
 0x629   : > { %v1737_v3 = vmul.f32 %v3300_v0, %v1736_v5 }
 0x62b   : > { %v1738_v6 = vadd.f32 %v3300_v0, %v1737_v3 }
 0x62d   : > { %v1742_v8 = vsel %vm1741_vm13, %v3300_v0, %v1738_v6  ;;  %v1880_v0 = vmul.f32 %v3302_v29, %v1879_v63 }
 0x62e   : > { %v1747_v18 = vsel %vm1744_vm14, %v1746_v7, %v1742_v8 }
 0x62f   : > { %v1748_v10 = vmul.f32 %v4076_v42, %v1747_v18  ;;  %v1881_v1 = vadd.f32 %v3302_v29, %v1880_v0  ;;  %v2924_v18 = vld [vmem:[%s3826_s19 + $0x70] sm:$0xf] }
 0x631   : > { %v1749_v11 = vpack.c.bf16 %v1748_v10, %v1748_v10  ;;  %v3113_v10 = vld [vmem:[%s3826_s19 + $0x74] sm:$0xf0] }
 0x633   : > { %2833 = vmatmul.msk.bf16.vlgmr.msra.gmra.mxu0 %vm1202_vm9, %v1749_v11  ;;  %vm1479_vm9 = vcmask 523264   ;;  %v3112_v11 = vld [vmem:[%s3826_s19 + $0x74] sm:$0xf] }
 0x66c   : > { %v1391_v13 = vpop.f32.mrf.mxu2 }
 0x66f   : > { %v1462_v56 = vpop.f32.mrf.mxu0 }
 0x674   : > { %v1393_v14 = vpop.f32.mrf.mxu2 }
 0x677   : > { %v1464_v15 = vpop.f32.mrf.mxu0 }
 0x678   : > { %v2916_v15 = vld [vmem:[%s3826_s19 + $0x60] sm:$0xf] }
 0x67c   : > { %v1549_v46 = vpop.f32.mrf.mxu2 }
 0x67f   : > { %v1625_v9 = vpop.f32.mrf.mxu0 }
 0x680   : > { %v3251_v17 = vpack.i.bf16 %v1625_v9, %v1320_v59  ;;  %v3110_v9 = vld [vmem:[%s3826_s19 + $0x64] sm:$0xf] }
 0x682   : > { %3252 = vrot.lane.b32.xlu0 %v3251_v17, %s3560_s25 }
 0x684   : > { %v1551_v19 = vpop.f32.mrf.mxu2 }
 0x685   : > { %v2918_v19 = vld [vmem:[%s3826_s19 + $0x68] sm:$0xf0] }
 0x687   : > { %v1627_v20 = vpop.f32.mrf.mxu0 }
 0x688   : > { %v2921_v20 = vor.u32 %v3110_v9, %v2918_v19 }
 0x68c   : > { %v1696_v48 = vpop.f32.mrf.mxu2 }
 0x68d   : > { %v3246_v42 = vpack.i.bf16 %v1696_v48, %v1391_v13  ;;  %v2925_v13 = vor.u32 %v3113_v10, %v2924_v18  ;;  %v2908_v48 = vld [vmem:[%s3826_s19 + $0x50] sm:$0xf] }
 0x68f   : > { %3247 = vrot.lane.b32.xlu1 %v3246_v42, %s3558_s11  ;;  %2033 = vmatpush.bf16.msrb.mxu2 %v2925_v13  ;;  %v3109_v42 = vld [vmem:[%s3826_s19 + $0x54] sm:$0xf0] }
 0x694   : > { %v1698_v21 = vpop.f32.mrf.mxu2 }
 0x695   : > { %v3108_v21 = vld [vmem:[%s3826_s19 + $0x54] sm:$0xf] }
 0x6b0   : > { %v1767_v22 = vpop.f32.mrf.mxu0 }
 0x6b1   : > { %v3256_v23 = vpack.i.bf16 %v1767_v22, %v1462_v56  ;;  %v2926_v56 = vld [vmem:[%s3826_s19 + $0x78] sm:$0xf0]  ;;  %v2909_v22 = vor.u32 %v3109_v42, %v2908_v48 }
 0x6b2   : > { %v2929_v14 = vor.u32 %v3112_v11, %v2926_v56 }
 0x6b3   : > { %3257 = vrot.lane.b32.xlu0 %v3256_v23, %s3559_s18  ;;  %v2910_v23 = vld [vmem:[%s3826_s19 + $0x58] sm:$0xf0] }
 0x6b4   : > { %2047 = vmatpush.bf16.msra.mxu3 %v2929_v14 }
 0x6b8   : > { %v1769_v24 = vpop.f32.mrf.mxu0  ;;  %2048 = vmatpush.bf16.msra.mxu3 %v2921_v20 }
 0x6b9   : > { %v2913_v24 = vor.u32 %v3108_v21, %v2910_v23  ;;  %v3120_v23 = vld [vmem:[%s3832_s28 + $0x30] sm:$0xff] }
 0x6bc   : > { %2049 = vmatpush.bf16.msra.mxu3 %v2913_v24  ;;  %v3128_v24 = vld [vmem:[%s3832_s28 + $0x70] sm:$0xff] }
 0x6c0   : > { %2050 = vmatpush.bf16.msra.mxu3 %v2905_v32  ;;  %v3125_v32 = vld [vmem:[%s3832_s28 + $0x58] sm:$0xff] }
 0x6f4   : > { %v3253_v35 = vpop.permute.xlu0 %3252 }
 0x6f5   : > { %v3255_v38 = vunpack.i.h.bf16 %v3253_v35  ;;  %v3254_v25 = vunpack.i.l.bf16 %v3253_v35  ;;  %v3104_v35 = vld [vmem:[%s3826_s19 + $0x34] sm:$0xf] }
 0x6f7   : > { %v1478_v16 = vsel %vm1179_vm7, %v4015_v12, %v3254_v25  ;;  %v1783_v49 = vsel %vm1179_vm7, %v1549_v46, %v3255_v38  ;;  %vm1882_vm7 = vweird.f32 %v3302_v29  ;;  %v3111_v46 = vld [vmem:[%s3826_s19 + $0x64] sm:$0xf0]  ;;  %v2894_v38 = vld [vmem:[%s3826_s19 + $0x38] sm:$0xf0] }
 0x6f8   : > { %v4150_v5 = vsel %vm1882_vm7, %v3302_v29, %v1881_v1  ;;  %v2917_v17 = vor.u32 %v3111_v46, %v2916_v15  ;;  %v2897_v25 = vor.u32 %v3104_v35, %v2894_v38  ;;  %v3264_v15 = vld [vmem:[%s4358_s13] ss:$0 sm:$0xff]  ;;  %v3115_v35 = vld [vmem:[%s3832_s28 + $0x8] sm:$0xff] }
 0x6f9   : > { %v1947_v38 = vld [vmem:[%s3870_s6] sm:$0x3] }
 0x6fa   : > { %2034 = vmatpush.bf16.msrb.mxu2 %v2917_v17  ;;  %2051 = vmatpush.bf16.msra.mxu3 %v2897_v25  ;;  %v3114_v25 = vld [vmem:[%s3832_s28] sm:$0xff] }
 0x6fe   : > { %2035 = vmatpush.bf16.msrb.mxu2 %v2909_v22  ;;  %v3129_v22 = vld [vmem:[%s3832_s28 + $0x78] sm:$0xff] }
 0x6ff   : > { %2245 = vmatpush.bf16.msra.mxu1 %v3129_v22 }
 0x701   : > { %v3248_v36 = vpop.permute.xlu1 %3247 }
 0x702   : > { %v3250_v39 = vunpack.i.h.bf16 %v3248_v36  ;;  %v3249_v40 = vunpack.i.l.bf16 %v3248_v36  ;;  %2036 = vmatpush.bf16.msrb.mxu2 %v2901_v30  ;;  %v2893_v36 = vor.u32 %v3105_v34, %v2892_v33  ;;  %v3126_v30 = vld [vmem:[%s3832_s28 + $0x60] sm:$0xff]  ;;  %v3116_v33 = vld [vmem:[%s3832_s28 + $0x10] sm:$0xff] }
 0x703   : > { %2246 = vmatpush.bf16.msra.mxu1 %v3128_v24  ;;  %v3124_v34 = vld [vmem:[%s3832_s28 + $0x50] sm:$0xff] }
 0x704   : > { %v1784_v47 = vsel %vm1479_vm9, %v1783_v49, %v3250_v39  ;;  %v1480_v37 = vsel %vm1479_vm9, %v1478_v16, %v3249_v40  ;;  %v2884_v39 = vld [vmem:[%s3826_s19 + $0x20] sm:$0xf]  ;;  %v3103_v40 = vld [vmem:[%s3826_s19 + $0x24] sm:$0xf0]  ;;  %v2886_v49 = vld [vmem:[%s3826_s19 + $0x28] sm:$0xf0] }
 0x705   : > { %v2885_v16 = vor.u32 %v3103_v40, %v2884_v39  ;;  %v3122_v39 = vld [vmem:[%s3832_s28 + $0x40] sm:$0xff]  ;;  %v1949_v40 = vperm.slane %v1947_v38, 0 }
 0x706   : > { %2037 = vmatpush.bf16.msrb.mxu2 %v2893_v36  ;;  %v3123_v36 = vld [vmem:[%s3832_s28 + $0x48] sm:$0xff] }
 0x707   : > { %2247 = vmatpush.bf16.msra.mxu1 %v3127_v27 }
 0x70a   : > { %2038 = vmatpush.bf16.msrb.mxu2 %v2885_v16 }
 0x70b   : > { %2248 = vmatpush.bf16.msra.mxu1 %v3126_v30 }
 0x70f   : > { %2249 = vmatpush.bf16.msra.mxu1 %v3125_v32 }
 0x713   : > { %2250 = vmatpush.bf16.msra.mxu1 %v3124_v34 }
 0x717   : > { %2251 = vmatpush.bf16.msra.mxu1 %v3123_v36 }
 0x71b   : > { %2252 = vmatpush.bf16.msra.mxu1 %v3122_v39 }
 0x725   : > { %v3258_v43 = vpop.permute.xlu0 %3257 }
 0x726   : > { %v3260_v50 = vunpack.i.h.bf16 %v3258_v43  ;;  %v3259_v51 = vunpack.i.l.bf16 %v3258_v43  ;;  %v3102_v43 = vld [vmem:[%s3826_s19 + $0x24] sm:$0xf] }
 0x728   : > { %v1785_v52 = vsel %vm1481_vm15, %v1784_v47, %v3260_v50  ;;  %v1482_v58 = vsel %vm1481_vm15, %v1480_v37, %v3259_v51  ;;  %v2889_v50 = vor.u32 %v3102_v43, %v2886_v49  ;;  %v2876_v51 = vld [vmem:[%s3826_s19 + $0x10] sm:$0xf]  ;;  %v3101_v47 = vld [vmem:[%s3826_s19 + $0x14] sm:$0xf0]  ;;  %v3100_v37 = vld [vmem:[%s3826_s19 + $0x14] sm:$0xf] }
 0x729   : > { %v1786_v53 = vpack.c.bf16 %v1785_v52, %v1482_v58  ;;  %v2877_v52 = vor.u32 %v3101_v47, %v2876_v51  ;;  %v2878_v58 = vld [vmem:[%s3826_s19 + $0x18] sm:$0xf0]  ;;  %v1950_v43 = vperm.slane %v1947_v38, 1 }
 0x72a   : > { %2052 = vmatpush.bf16.msra.mxu3 %v2889_v50 }
 0x72b   : > { %1863 = vmatmul.bf16.vlgmr.msrb.gmra.mxu1 %v1786_v53  ;;  %v2868_v53 = vld [vmem:[%s3826_s19] sm:$0xf]  ;;  %2039 = vmatpush.bf16.msrb.mxu2 %v2877_v52 }
 0x7a8   : > { %v1864_v54 = vpop.f32.mrf.mxu1 }
 0x7a9   : > { %v1865_v55 = vadd.f32 %v3263_v45, %v1864_v54 }
 0x7ab   : > { %v1869_v57 = vadd.f32 %v1865_v55, %v3940_v41  ;;  %v2881_v55 = vor.u32 %v3100_v37, %v2878_v58 }
 0x7ad   : > { %1873 = vadd.xlane.f32.xlu2 %v1869_v57  ;;  %2053 = vmatpush.bf16.msra.mxu3 %v2881_v55 }
 0x7b0   : > { %v1866_v12 = vpop.f32.mrf.mxu1 }
 0x7b1   : > { %v1867_v59 = vadd.f32 %v3263_v45, %v1866_v12  ;;  %v3099_v45 = vld [vmem:[%s3826_s19 + $0x4] sm:$0xf0]  ;;  %v2870_v12 = vld [vmem:[%s3826_s19 + $0x8] sm:$0xf0] }
 0x7b3   : > { %v1870_v60 = vadd.f32 %v1867_v59, %v3942_v44 }
 0x7b5   : > { %1875 = vadd.xlane.f32.xlu0 %v1870_v60 }
 0x820   : > { %v1874_v41 = vpop.xlane.xlu2 %1873 }
 0x821   : > { %v1884_v2 = vmul.f32 %v4150_v5, %v1874_v41 }
 0x823   : > { %v4153_v3 = vsub.f32 %v1869_v57, %v1884_v2  ;;  %v3098_v57 = vld [vmem:[%s3826_s19 + $0x4] sm:$0xf] }
 0x824   : > { %v2873_v61 = vor.u32 %v3098_v57, %v2870_v12 }
 0x825   : > { %v1888_v44 = vmul.f32 %v4153_v3, %v4153_v3 }
 0x826   : > { %2054 = vmatpush.bf16.msra.mxu3 %v2873_v61 }
 0x827   : > { %1890 = vadd.xlane.f32.xlu2 %v1888_v44 }
 0x828   : > { %v1876_v4 = vpop.xlane.xlu0 %1875 }
 0x829   : > { %v1885_v6 = vmul.f32 %v4150_v5, %v1876_v4 }
 0x82b   : > { %v4158_v7 = vsub.f32 %v1870_v60, %v1885_v6  ;;  %v2869_v60 = vor.u32 %v3099_v45, %v2868_v53 }
 0x82d   : > { %v1889_v8 = vmul.f32 %v4158_v7, %v4158_v7  ;;  %2040 = vmatpush.bf16.msrb.mxu2 %v2869_v60 }
 0x82f   : > { %1892 = vadd.xlane.f32.xlu2 %v1889_v8 }
 0x89a   : > { %v1891_v54 = vpop.xlane.xlu2 %1890 }
 0x89b   : > { %v1894_v59 = vmul.f32 %v1891_v54, %v4150_v5 }
 0x89d   : > { %v1896_v29 = vadd.f32 1e-12, %v1894_v59 }
 0x89f   : > { %3303 = vrsqrt.f32 %v1896_v29  ;;  %vm1904_vm1 = vweird.f32 %v1896_v29 }
 0x8a2   : > { %v1893_v62 = vpop.xlane.xlu2 %1892 }
 0x8a3   : > { %v1895_v63 = vmul.f32 %v1893_v62, %v4150_v5 }
 0x8a5   : > { %v3304_v0 = vpop.eup %3303  ;;  %v1897_v1 = vadd.f32 1e-12, %v1895_v63 }
 0x8a6   : > { %v1899_v41 = vmul.f32 %v3304_v0, %v1896_v29  ;;  %vm1905_vm0 = vweird.f32 %v3304_v0 }
 0x8a7   : > { %3305 = vrsqrt.f32 %v1897_v1  ;;  %vm1906_vm2 = vmor %vm1904_vm1, %vm1905_vm0  ;;  %vm1914_vm4 = vweird.f32 %v1897_v1 }
 0x8a8   : > { %v1900_v2 = vmul.f32 %v3304_v0, %v1899_v41 }
 0x8aa   : > { %v1901_v44 = vmul.f32 0.5, %v1900_v2 }
 0x8ac   : > { %v1902_v4 = vsub.f32 1.5, %v1901_v44 }
 0x8ad   : > { %v3306_v6 = vpop.eup %3305 }
 0x8ae   : > { %v1903_v8 = vmul.f32 %v3304_v0, %v1902_v4  ;;  %v1909_v18 = vmul.f32 %v3306_v6, %v1897_v1  ;;  %vm1915_vm3 = vweird.f32 %v3306_v6 }
 0x8af   : > { %vm1916_vm8 = vmor %vm1914_vm4, %vm1915_vm3 }
 0x8b0   : > { %v1910_v10 = vmul.f32 %v3306_v6, %v1909_v18  ;;  %v1907_v11 = vsel %vm1906_vm2, %v3304_v0, %v1903_v8 }
 0x8b1   : > { %v1918_v14 = vmul.f32 %v1907_v11, %v4153_v3  ;;  %v3265_v3 = vld [vmem:[%s876_s24] ss:$0 sm:$0xff] }
 0x8b2   : > { %v1911_v13 = vmul.f32 0.5, %v1910_v10 }
 0x8b3   : > { %v1923_v19 = vmul.f32 %v3264_v15, %v1918_v14 }
 0x8b4   : > { %v1912_v56 = vsub.f32 1.5, %v1911_v13 }
 0x8b5   : > { %v4208_v48 = vadd.f32 %v3265_v3, %v1923_v19 }
 0x8b6   : > { %v1913_v46 = vmul.f32 %v3306_v6, %v1912_v56 }
 0x8b8   : > { %v1917_v9 = vsel %vm1916_vm8, %v3306_v6, %v1913_v46 }
 0x8b9   : > { %v1919_v17 = vmul.f32 %v1917_v9, %v4158_v7  ;;  %v3121_v7 = vld [vmem:[%s3832_s28 + $0x38] sm:$0xff] }
 0x8ba   : > { %2231 = vmatpush.bf16.msrb.mxu0 %v3121_v7 }
 0x8bb   : > { %v1924_v20 = vmul.f32 %v3264_v15, %v1919_v17 }
 0x8bd   : > { %v4210_v42 = vadd.f32 %v3265_v3, %v1924_v20 }
 0x8be   : > { %2232 = vmatpush.bf16.msrb.mxu0 %v3120_v23 }
 0x8bf   : > { %v1930_v21 = vpack.c.bf16 %v4210_v42, %v4208_v48 }
 0x8c1   : > { %2041 = vmatmul.bf16.vlgmr.msrb.gmra.mxu2 %v1930_v21  ;;  %2055 = vmatmul.bf16.vlgmr.msra.gmra.mxu3 %v1930_v21 }
 0x8c2   : > { %2233 = vmatpush.bf16.msrb.mxu0 %v3119_v26  ;;  %v3266_v26 = vld [vmem:[%s883_s20] ss:$0 sm:$0xff] }
 0x8c6   : > { %2234 = vmatpush.bf16.msrb.mxu0 %v3118_v28 }
 0x8ca   : > { %2235 = vmatpush.bf16.msrb.mxu0 %v3117_v31 }
 0x8ce   : > { %2236 = vmatpush.bf16.msrb.mxu0 %v3116_v33 }
 0x8d2   : > { %2237 = vmatpush.bf16.msrb.mxu0 %v3115_v35 }
 0x8d6   : > { %2238 = vmatpush.bf16.msrb.mxu0 %v3114_v25 }
 0x944   : > { %v2042_v16 = vpop.f32.mrf.mxu2  ;;  %v2056_v49 = vpop.f32.mrf.mxu3 }
 0x945   : > { %v2043_v50 = vadd.f32 %v2042_v16, %v1949_v40  ;;  %v2057_v51 = vadd.f32 %v2056_v49, %v1950_v43 }
 0x947   : > { %v2065_v47 = vmul.f32 0.044715, %v2043_v50  ;;  %v2066_v37 = vmul.f32 0.044715, %v2057_v51  ;;  %v2061_v15 = vmul.f32 0.5, %v2043_v50  ;;  %v2062_v17 = vmul.f32 0.5, %v2057_v51 }
 0x949   : > { %v2069_v52 = vmul.f32 %v2065_v47, %v2043_v50  ;;  %v2070_v58 = vmul.f32 %v2066_v37, %v2057_v51 }
 0x94b   : > { %v2073_v53 = vmul.f32 %v2069_v52, %v2043_v50  ;;  %v2074_v45 = vmul.f32 %v2070_v58, %v2057_v51 }
 0x94c   : > { %v2044_v54 = vpop.f32.mrf.mxu2  ;;  %v2058_v55 = vpop.f32.mrf.mxu3 }
 0x94d   : > { %v2077_v57 = vadd.f32 %v2073_v53, %v2043_v50  ;;  %v2045_v12 = vadd.f32 %v2044_v54, %v1949_v40  ;;  %v2059_v59 = vadd.f32 %v2058_v55, %v1950_v43  ;;  %v2078_v60 = vadd.f32 %v2074_v45, %v2057_v51 }
 0x94f   : > { %v2067_v61 = vmul.f32 0.044715, %v2045_v12  ;;  %v2068_v29 = vmul.f32 0.044715, %v2059_v59  ;;  %v2081_v62 = vmul.f32 0.7978846, %v2077_v57 }
 0x950   : > { %v2082_v0 = vmul.f32 0.7978846, %v2078_v60  ;;  %v2063_v46 = vmul.f32 0.5, %v2045_v12  ;;  %v2064_v19 = vmul.f32 0.5, %v2059_v59 }
 0x951   : > { %v2071_v63 = vmul.f32 %v2067_v61, %v2045_v12  ;;  %v2072_v1 = vmul.f32 %v2068_v29, %v2059_v59  ;;  %3307 = vtanh.f32 %v2081_v62  ;;  %v3267_v61 = vld [vmem:[%s886_s12] ss:$0 sm:$0xff] }
 0x952   : > { %3309 = vtanh.f32 %v2082_v0  ;;  %v3268_v62 = vld [vmem:[%s889_s15] ss:$0 sm:$0xff]  ;;  %s4363_s15 = sld [smem:[#allocation36_spill]] (!%p2994_p1) }
 0x953   : > { %v2075_v41 = vmul.f32 %v2071_v63, %v2045_v12  ;;  %v2076_v2 = vmul.f32 %v2072_v1, %v2059_v59 }
 0x955   : > { %v2079_v44 = vadd.f32 %v2075_v41, %v2045_v12  ;;  %v2080_v4 = vadd.f32 %v2076_v2, %v2059_v59 }
 0x957   : > { %v2083_v6 = vmul.f32 0.7978846, %v2079_v44  ;;  %v2084_v8 = vmul.f32 0.7978846, %v2080_v4  ;;  %v3308_v18 = vpop.eup %3307 }
 0x958   : > { %v3310_v10 = vpop.eup %3309  ;;  %v2089_v11 = vadd.f32 1.0, %v3308_v18 }
 0x959   : > { %3311 = vtanh.f32 %v2083_v6  ;;  %v2090_v56 = vadd.f32 1.0, %v3310_v10 }
 0x95a   : > { %3313 = vtanh.f32 %v2084_v8  ;;  %v2093_v20 = vmul.f32 %v2089_v11, %v2061_v15 }
 0x95b   : > { %v2094_v7 = vmul.f32 %v2090_v56, %v2062_v17 }
 0x95f   : > { %v3312_v13 = vpop.eup %3311 }
 0x960   : > { %v3314_v14 = vpop.eup %3313  ;;  %v2091_v9 = vadd.f32 1.0, %v3312_v13 }
 0x961   : > { %v2092_v3 = vadd.f32 1.0, %v3314_v14 }
 0x962   : > { %v2095_v21 = vmul.f32 %v2091_v9, %v2063_v46 }
 0x963   : > { %v2096_v22 = vmul.f32 %v2092_v3, %v2064_v19 }
 0x964   : > { %v2097_v23 = vpack.c.bf16 %v2095_v21, %v2093_v20 }
 0x965   : > { %v2098_v24 = vpack.c.bf16 %v2096_v22, %v2094_v7 }
 0x966   : > { %2239 = vmatmul.bf16.vlgmr.msrb.gmra.mxu0 %v2097_v23 }
 0x967   : > { %2253 = vmatmul.bf16.vlgmr.msra.gmra.mxu1 %v2098_v24 }
 0x9e3   : > { %v2240_v27 = vpop.f32.mrf.mxu0 }
 0x9e4   : > { %v2241_v28 = vadd.f32 %v3266_v26, %v2240_v27  ;;  %v2254_v30 = vpop.f32.mrf.mxu1 }
 0x9e6   : > { %v2255_v31 = vadd.f32 %v2254_v30, %v2241_v28 }
 0x9e8   : > { %v2259_v32 = vadd.f32 %v2255_v31, %v4208_v48 }
 0x9ea   : > { %2263 = vadd.xlane.f32.xlu1 %v2259_v32 }
 0x9eb   : > { %v2242_v33 = vpop.f32.mrf.mxu0 }
 0x9ec   : > { %v2243_v34 = vadd.f32 %v3266_v26, %v2242_v33  ;;  %v2256_v35 = vpop.f32.mrf.mxu1 }
 0x9ee   : > { %v2257_v36 = vadd.f32 %v2256_v35, %v2243_v34 }
 0x9f0   : > { %v2260_v38 = vadd.f32 %v2257_v36, %v4210_v42 }
 0x9f2   : > { %2265 = vadd.xlane.f32.xlu2 %v2260_v38 }
 0xa5d   : > { %v2264_v25 = vpop.xlane.xlu1 %2263 }
 0xa5e   : > { %v2267_v39 = vmul.f32 %v2264_v25, %v4150_v5 }
 0xa60   : > { %v2269_v40 = vsub.f32 %v2259_v32, %v2267_v39 }
 0xa62   : > { %v2271_v43 = vmul.f32 %v2269_v40, %v2269_v40 }
 0xa64   : > { %2273 = vadd.xlane.f32.xlu2 %v2271_v43 }
 0xa65   : > { %v2266_v16 = vpop.xlane.xlu2 %2265 }
 0xa66   : > { %v2268_v49 = vmul.f32 %v2266_v16, %v4150_v5 }
 0xa68   : > { %v2270_v50 = vsub.f32 %v2260_v38, %v2268_v49 }
 0xa6a   : > { %v2272_v51 = vmul.f32 %v2270_v50, %v2270_v50 }
 0xa6c   : > { %2275 = vadd.xlane.f32.xlu2 %v2272_v51 }
 0xad7   : > { %v2274_v48 = vpop.xlane.xlu2 %2273 }
 0xad8   : > { %v2277_v47 = vmul.f32 %v2274_v48, %v4150_v5 }
 0xada   : > { %v2279_v37 = vadd.f32 1e-12, %v2277_v47 }
 0xadc   : > { %3315 = vrsqrt.f32 %v2279_v37  ;;  %vm2287_vm6 = vweird.f32 %v2279_v37 }
 0xadf   : > { %v2276_v42 = vpop.xlane.xlu2 %2275 }
 0xae0   : > { %v2278_v52 = vmul.f32 %v2276_v42, %v4150_v5 }
 0xae2   : > { %v3316_v58 = vpop.eup %3315  ;;  %v2280_v53 = vadd.f32 1e-12, %v2278_v52 }
 0xae3   : > { %v2282_v45 = vmul.f32 %v3316_v58, %v2279_v37  ;;  %vm2288_vm5 = vweird.f32 %v3316_v58 }
 0xae4   : > { %3317 = vrsqrt.f32 %v2280_v53  ;;  %vm2289_vm10 = vmor %vm2287_vm6, %vm2288_vm5  ;;  %vm2297_vm12 = vweird.f32 %v2280_v53 }
 0xae5   : > { %v2283_v54 = vmul.f32 %v3316_v58, %v2282_v45 }
 0xae7   : > { %v2284_v55 = vmul.f32 0.5, %v2283_v54 }
 0xae9   : > { %v2285_v57 = vsub.f32 1.5, %v2284_v55 }
 0xaea   : > { %v3318_v12 = vpop.eup %3317 }
 0xaeb   : > { %v2286_v59 = vmul.f32 %v3316_v58, %v2285_v57  ;;  %v2292_v60 = vmul.f32 %v3318_v12, %v2280_v53  ;;  %vm2298_vm11 = vweird.f32 %v3318_v12 }
 0xaec   : > { %vm2299_vm13 = vmor %vm2297_vm12, %vm2298_vm11 }
 0xaed   : > { %v2290_v5 = vsel %vm2289_vm10, %v3316_v58, %v2286_v59  ;;  %v2293_v29 = vmul.f32 %v3318_v12, %v2292_v60 }
 0xaee   : > { %v2301_v63 = vmul.f32 %v2290_v5, %v2269_v40 }
 0xaef   : > { %v2294_v0 = vmul.f32 0.5, %v2293_v29 }
 0xaf0   : > { %v2306_v1 = vmul.f32 %v3267_v61, %v2301_v63 }
 0xaf1   : > { %v2295_v41 = vsub.f32 1.5, %v2294_v0 }
 0xaf2   : > { %v2311_v2 = vadd.f32 %v3268_v62, %v2306_v1 }
 0xaf3   : > { %v2296_v44 = vmul.f32 %v3318_v12, %v2295_v41 }
 0xaf4   : > { %2313 = vst [vmem:[#allocation2] sm:$0xff] %v2311_v2 }
 0xaf5   : > { %v2300_v4 = vsel %vm2299_vm13, %v3318_v12, %v2296_v44 }
 0xaf6   : > { %v2302_v6 = vmul.f32 %v2300_v4, %v2270_v50 }
 0xaf8   : > { %v2307_v8 = vmul.f32 %v3267_v61, %v2302_v6  ;;  %2318 = sbr.rel (%p2994_p1) target bundleno = 3116 (0xc2c), region = 128 }
 0xafa   : > { %v2312_v18 = vadd.f32 %v3268_v62, %v2307_v8 }
 0xafc   : > { %2314 = vst [vmem:[#allocation2 + $0x8] sm:$0xff] %v2312_v18 }
 0xafd   : > { %v3137_v10 = vld [vmem:[#allocation9 + $0x38] sm:$0xff]  ;;  %v3136_v11 = vld [vmem:[#allocation9 + $0x30] sm:$0xff]  ;;  %v3135_v14 = vld [vmem:[#allocation9 + $0x28] sm:$0xff]  ;;  %v2320_v21 = vrot.slane %v2312_v18, 7  ;;  %vm2322_vm14 = vcmask 1040384  }
 0xafe   : > { %2393 = vmatpush.bf16.msra.mxu0 %v3137_v10  ;;  %v3145_v13 = vld [vmem:[#allocation11 + $0x38] sm:$0xff]  ;;  %v3144_v56 = vld [vmem:[#allocation11 + $0x30] sm:$0xff]  ;;  %v3143_v15 = vld [vmem:[#allocation11 + $0x28] sm:$0xff] }
 0xaff   : > { %2476 = vmatpush.bf16.msra.mxu1 %v3145_v13  ;;  %v3134_v46 = vld [vmem:[#allocation9 + $0x20] sm:$0xff]  ;;  %v3133_v17 = vld [vmem:[#allocation9 + $0x18] sm:$0xff]  ;;  %v3132_v3 = vld [vmem:[#allocation9 + $0x10] sm:$0xff]  ;;  %v2323_v22 = vsel %vm2322_vm14, %v2311_v2, %v2320_v21 }
 0xb00   : > { %v3142_v9 = vld [vmem:[#allocation11 + $0x20] sm:$0xff]  ;;  %v3141_v19 = vld [vmem:[#allocation11 + $0x18] sm:$0xff]  ;;  %v3131_v20 = vld [vmem:[#allocation9 + $0x8] sm:$0xff]  ;;  %v2324_v23 = vpack.c.bf16 %v2323_v22, %v2323_v22 }
 0xb01   : > { %v3130_v7 = vld [vmem:[#allocation9] sm:$0xff]  ;;  %v3140_v24 = vld [vmem:[#allocation11 + $0x10] sm:$0xff]  ;;  %v3139_v26 = vld [vmem:[#allocation11 + $0x8] sm:$0xff] }
 0xb02   : > { %2394 = vmatpush.bf16.msra.mxu0 %v3136_v11  ;;  %v3138_v27 = vld [vmem:[#allocation11] sm:$0xff]  ;;  %v3319_v28 = vld [vmem:[%s4363_s15] ss:$0 sm:$0xff] }
 0xb03   : > { %2477 = vmatpush.bf16.msra.mxu1 %v3144_v56  ;;  %v3320_v35 = vld [vmem:[%s4364_s9] ss:$0 sm:$0xff] }
 0xb06   : > { %2395 = vmatpush.bf16.msra.mxu0 %v3135_v14 }
 0xb07   : > { %2478 = vmatpush.bf16.msra.mxu1 %v3143_v15 }
 0xb0a   : > { %2396 = vmatpush.bf16.msra.mxu0 %v3134_v46 }
 0xb0b   : > { %2479 = vmatpush.bf16.msra.mxu1 %v3142_v9 }
 0xb0e   : > { %2397 = vmatpush.bf16.msra.mxu0 %v3133_v17 }
 0xb0f   : > { %2480 = vmatpush.bf16.msra.mxu1 %v3141_v19 }
 0xb12   : > { %2398 = vmatpush.bf16.msra.mxu0 %v3132_v3 }
 0xb13   : > { %2481 = vmatpush.bf16.msra.mxu1 %v3140_v24 }
 0xb16   : > { %2399 = vmatpush.bf16.msra.mxu0 %v3131_v20 }
 0xb17   : > { %2482 = vmatpush.bf16.msra.mxu1 %v3139_v26 }
 0xb1a   : > { %2400 = vmatpush.bf16.msra.mxu0 %v3130_v7 }
 0xb1b   : > { %2483 = vmatpush.bf16.msra.mxu1 %v3138_v27 }
 0xb1d   : > { %2401 = vmatmul.bf16.vlgmr.msra.gmra.mxu0 %v2324_v23 }
 0xb9a   : > { %v2402_v30 = vpop.f32.mrf.mxu0 }
 0xb9b   : > { %v2403_v31 = vadd.f32 %v3319_v28, %v2402_v30 }
 0xb9d   : > { %3321 = vtanh.f32 %v2403_v31 }
 0xba2   : > { %v2404_v32 = vpop.f32.mrf.mxu0 }
 0xba3   : > { %v3322_v33 = vpop.eup %3321 }
 0xba4   : > { %v2407_v34 = vpack.c.bf16 %v3322_v33, %v3322_v33 }
 0xba6   : > { %2484 = vmatmul.bf16.vlgmr.msra.gmra.mxu1 %v2407_v34 }
 0xc23   : > { %v2485_v36 = vpop.f32.mrf.mxu1 }
 0xc24   : > { %v2486_v38 = vadd.f32 %v3320_v35, %v2485_v36 }
 0xc26   : > { %2489 = vst [vmem:[#allocation12] sm:$0x3] %v2486_v38 }
 0xc2b   : > { %v2487_v25 = vpop.f32.mrf.mxu1 }
 0xc2c PF: > { %p3190_p4 = scmp.eq.s32.totalorder %s3687_s2, 1  ;;  %s3562_s27 = smov [#allocation12]  }
 0xc2d   : > { %s2496_s23 = sshll.u32 %s3562_s27, 4  ;;  %s4365_s5 = sld [smem:[#allocation39_spill]]  ;;  %s2497_s23 = int_to_ptr.vmem [resolvable:$true] %s2496_s23 }
 0xc33   : > { %s2498_s26 = sshll.u32 %s4365_s5, 4  ;;  %s2499_s26 = int_to_ptr.hbm [resolvable:$true] %s2498_s26 }
 0xc34   : > { %3165 = dma.vmem_to_hbm [thread:$0]  (%p3190_p4), %s2497_s23, 32, %s2499_s26, [#allocation5]  }
 0xc35   : > { %3530 = dma.done.wait (%p3190_p4), [#allocation5], 32  }
 0xc36   : > { %3532 = vsyncadd (%p3190_p4), [#allocation5], 4294967264 }
 0xc37 PF: > { %s4366_s24 = sld [smem:[#allocation18_spill]]  ;;  %s4369_s1 = smov %s3539_s22 }
 0xc38   : > { %s4367_s13 = sld [smem:[#allocation17_spill]] }
 0xc39   : > { %s4368_s23 = sld [smem:[#allocation19_spill]] }
 0xc3d   : > { %p35_p5 = scmp.ge.s32.totalorder %s4366_s24, 4  }
 0xc3e   : > { %s4370_s22 = smov %s4367_s13 }
 0xc3f   :  { %37 = sbr.rel (!%p35_p5) target bundleno = 28 (0x1c), region = 204 }
 0xc44   :  { %2512 = vsyncpa [#allocation4], 1 }
 0xc45   :  { %2514 = vsyncpa [#allocation4 + $0x1], 1 }
 0xc46   :  { %2515 = vsyncpa [#allocation7], 1 }
 0xc47   :  { %2517 = vsyncpa [#allocation7 + $0x1], 1 }
 0xc48   :  { %2518 = vsyncpa [#allocation10], 1 }
 0xc49   :  { %2519 = vsyncpa [#allocation5], 1 }
 0xc4a   :  { %2521 = vsyncpa [#allocation5 + $0x1], 1 }

</bundles_post_ra>
